<compile_context>
chip_gen: v7x
topology: tpu7x:2x2x1
jax: 0.10.0
libtpu: 0.0.40
codegen_flags: <defaults>
</compile_context>

<pallas_src>
import functools

import jax
import jax.numpy as jnp
from jax.experimental import pallas as pl
from jax.experimental.pallas import tpu as pltpu

# --- model hyperparameters (from the PyTorch source) ---
block_size = 32
n_embd = 32
num_heads = 4
head_size = n_embd // num_heads  # 8


def _mha_kernel(x_ref, wqkv_ref, wp_ref, bp_ref, bias_ref, o_ref, *, heads, hdim):
    """One grid step == Bt batch elements.

    x_ref    : (Bt, T, C)
    wqkv_ref : (C, 3C)    fused [Q | K | V] per-head projection weights
    wp_ref   : (C, C)     output projection (already transposed: o @ wp)
    bp_ref   : (1, C)     output projection bias
    bias_ref : (T, T)     additive causal bias (0 on/below diagonal, -1e30 above)
    o_ref    : (Bt, T, C)
    """
    Bt, T, C = x_ref.shape
    H, hs = heads, hdim
    n = Bt * T
    cdt = wqkv_ref.dtype          # MXU operand dtype (f32, or bf16 when wrapper casts)

    # ---- fused QKV projection on the flattened (Bt*T, C) slab: one MXU matmul ----
    xf = x_ref[...].reshape(n, C).astype(cdt)                 # leading-dim merge only
    qkv = jnp.dot(xf, wqkv_ref[...], preferred_element_type=jnp.float32)   # (n, 3C) f32
    qkv = qkv.reshape(Bt, T, 3 * C)                           # leading-dim split only

    bias = bias_ref[...]                                      # (T, T), broadcast over Bt
    scale = float(hs) ** -0.5

    out = None                                                # (n, C) f32 accumulator
    for h in range(H):                                        # H tiny & static -> unrolled
        q_h = qkv[:, :, h * hs:(h + 1) * hs]                  # (Bt, T, hs) static lane slices
        k_h = qkv[:, :, C + h * hs:C + (h + 1) * hs]
        v_h = qkv[:, :, 2 * C + h * hs:2 * C + (h + 1) * hs]

        # scores: contract on the last dim -> no explicit k.T / XLU transpose
        s = jnp.einsum('btd,bsd->bts', q_h.astype(cdt), k_h.astype(cdt),
                       preferred_element_type=jnp.float32)    # (Bt, T, T)
        s = s * scale + bias                                  # causal mask as additive bias

        # numerically-stable softmax; one reciprocal per row + broadcast multiply
        m = jnp.max(s, axis=-1, keepdims=True)
        e = jnp.exp(s - m)
        den = jnp.sum(e, axis=-1, keepdims=True)
        p = e * pl.reciprocal(den, approx=False)
        # attention-dropout: identity in eval mode

        ctx = jnp.einsum('bts,bsd->btd', p.astype(cdt), v_h.astype(cdt),
                         preferred_element_type=jnp.float32)  # (Bt, T, hs)

        # Fold the head-concat into the output projection (no jnp.concatenate):
        #   proj(concat_h ctx_h) == sum_h ctx_h @ Wp[h*hs:(h+1)*hs, :]
        contrib = jnp.dot(ctx.reshape(n, hs).astype(cdt),
                          wp_ref[h * hs:(h + 1) * hs, :],
                          preferred_element_type=jnp.float32)  # (n, C)
        out = contrib if out is None else out + contrib

    out = out + bp_ref[...]                                   # (n, C) + (1, C)
    # residual-dropout: identity in eval mode
    o_ref[...] = out.reshape(Bt, T, C).astype(o_ref.dtype)    # single full-block store


def _choose_block_b(B, max_block_b=8):
    """Largest divisor of B that is <= max_block_b; prefer >=2 grid steps (v7x has 2 TCs)."""
    bt = max(1, min(B, max_block_b))
    while B % bt != 0:
        bt -= 1
    if B // bt == 1 and B > 1 and B % 2 == 0:
        bt = B // 2
    return bt


def multi_head_attention(x, wk, wq, wv, wproj, bproj, *, max_block_b=8, use_bf16=False):
    """x: (B, T, C).  wk/wq/wv: (H, C, hs) (per-head, pre-transposed for x @ w).
    wproj: (C, C) PyTorch (out, in) layout.  bproj: (C,)."""
    B, T, C = x.shape
    H, _, hs = wq.shape
    assert H * hs == C, "num_heads * head_size must equal n_embd"

    def stack(w):                                  # (H, C, hs) -> (C, H*hs), head-major columns
        return jnp.transpose(w, (1, 0, 2)).reshape(C, H * hs)

    wqkv = jnp.concatenate([stack(wq), stack(wk), stack(wv)], axis=-1)    # (C, 3C)
    wp_t = wproj.T                                                         # (C, C): o @ wp_t
    bp = bproj.reshape(1, C).astype(jnp.float32)

    # causal mask as additive bias, built once in the wrapper (resident across grid steps)
    tril = jnp.tril(jnp.ones((T, T), dtype=bool))
    bias = jnp.where(tril, 0.0, -1e30).astype(jnp.float32)

    xc = x
    if use_bf16:   # bf16 MXU operands (v6e/v7x); accumulation + softmax stay f32
        xc = x.astype(jnp.bfloat16)
        wqkv = wqkv.astype(jnp.bfloat16)
        wp_t = wp_t.astype(jnp.bfloat16)

    bt = _choose_block_b(B, max_block_b)
    grid = (B // bt,)

    kernel = functools.partial(_mha_kernel, heads=H, hdim=hs)

    return pl.pallas_call(
        kernel,
        out_shape=jax.ShapeDtypeStruct((B, T, C), x.dtype),
        grid_spec=pltpu.PrefetchScalarGridSpec(
            num_scalar_prefetch=0,
            grid=grid,
            in_specs=[
                pl.BlockSpec((bt, T, C), lambda b: (b, 0, 0)),
                # weights / bias: constant index maps -> stay resident across grid steps
                pl.BlockSpec((C, 3 * C), lambda b: (0, 0)),
                pl.BlockSpec((C, C), lambda b: (0, 0)),
                pl.BlockSpec((1, C), lambda b: (0, 0)),
                pl.BlockSpec((T, T), lambda b: (0, 0)),
            ],
            out_specs=pl.BlockSpec((bt, T, C), lambda b: (b, 0, 0)),
        ),
        compiler_params=pltpu.CompilerParams(
            dimension_semantics=("parallel",),
            # tiles are tiny, but keep the VMEM budget deliberate
            # (v7x physical VMEM is 64 MiB; 32 MiB scoped is safe on v5e/v6e/v7x).
            vmem_limit_bytes=32 * 1024 * 1024,
        ),
    )(xc, wqkv, wp_t, bp, bias)


def _reference(x, wk, wq, wv, wproj, bproj):
    """Pure-JAX reference mirroring the PyTorch forward (eval mode)."""
    B, T, C = x.shape
    H, _, hs = wq.shape
    mask = jnp.tril(jnp.ones((T, T), dtype=bool))
    outs = []
    for h in range(H):
        k = x @ wk[h]
        q = x @ wq[h]
        v = x @ wv[h]
        wei = (q @ jnp.swapaxes(k, -2, -1)) * (hs ** -0.5)
        wei = jnp.where(mask, wei, -jnp.inf)
        wei = jax.nn.softmax(wei, axis=-1)
        outs.append(wei @ v)
    o = jnp.concatenate(outs, axis=-1)
    return o @ wproj.T + bproj


if __name__ == "__main__":
    key = jax.random.PRNGKey(0)
    kx, kk, kq, kv, kp, kb = jax.random.split(key, 6)

    B, T, C = 4, block_size, n_embd           # (4, 32, 32); T == block_size
    x = jax.random.normal(kx, (B, T, C), dtype=jnp.float32)

    # deterministic synthetic parameters (per-head weights pre-transposed for x @ w)
    wk = jax.random.normal(kk, (num_heads, C, head_size), dtype=jnp.float32) * 0.1
    wq = jax.random.normal(kq, (num_heads, C, head_size), dtype=jnp.float32) * 0.1
    wv = jax.random.normal(kv, (num_heads, C, head_size), dtype=jnp.float32) * 0.1
    wproj = jax.random.normal(kp, (C, C), dtype=jnp.float32) * 0.1   # (out, in)
    bproj = jax.random.normal(kb, (C,), dtype=jnp.float32) * 0.1

    out = multi_head_attention(x, wk, wq, wv, wproj, bproj)
    out = jax.block_until_ready(out)

    ref = _reference(x, wk, wq, wv, wproj, bproj)
    assert out.shape == (B, T, C)
    assert jnp.allclose(out, ref, atol=2e-4, rtol=2e-4), "mismatch vs reference"

    print("KERNEL_OK")
</pallas_src>

<mosaic_0001>
module attributes {stable_mosaic.version = 11 : i64} {
  func.func @_mha_kernel(%arg0: i32, %arg1: memref<2x32x32xf32, #tpu.memory_space<vmem>>, %arg2: memref<32x96xf32, #tpu.memory_space<vmem>>, %arg3: memref<32x32xf32, #tpu.memory_space<vmem>>, %arg4: memref<1x32xf32, #tpu.memory_space<vmem>>, %arg5: memref<32x32xf32, #tpu.memory_space<vmem>>, %arg6: memref<2x32x32xf32, #tpu.memory_space<vmem>>) attributes {dimension_semantics = [#tpu.dimension_semantics<parallel>], iteration_bounds = array<i64: 2>, scalar_prefetch = 0 : i64, scratch_operands = 0 : i64, tpu.core_type = #tpu.core_type<tc>, window_params = [{transform_indices = @transform_0, window_bounds = array<i64: 2, 32, 32>}, {pipeline_mode = #tpu.pipeline_mode<synchronous>, transform_indices = @transform_1, window_bounds = array<i64: 32, 96>}, {pipeline_mode = #tpu.pipeline_mode<synchronous>, transform_indices = @transform_2, window_bounds = array<i64: 32, 32>}, {pipeline_mode = #tpu.pipeline_mode<synchronous>, transform_indices = @transform_3, window_bounds = array<i64: 1, 32>}, {pipeline_mode = #tpu.pipeline_mode<synchronous>, transform_indices = @transform_4, window_bounds = array<i64: 32, 32>}, {transform_indices = @transform_5, window_bounds = array<i64: 2, 32, 32>}]} {
    %c0 = arith.constant 0 : index
    %c0_0 = arith.constant 0 : index
    %c0_1 = arith.constant 0 : index
    %0 = vector.load %arg1[%c0, %c0_0, %c0_1] : memref<2x32x32xf32, #tpu.memory_space<vmem>>, vector<2x32x32xf32>
    %1 = vector.shape_cast %0 : vector<2x32x32xf32> to vector<64x32xf32>
    %c0_2 = arith.constant 0 : index
    %c0_3 = arith.constant 0 : index
    %2 = vector.load %arg2[%c0_2, %c0_3] : memref<32x96xf32, #tpu.memory_space<vmem>>, vector<32x96xf32>
    %cst = arith.constant dense<0.000000e+00> : vector<64x96xf32>
    %3 = tpu.matmul %1, %2, %cst {dimension_numbers = #tpu.dot_dimension_numbers<[1], [0], [0], [1], [0, 0, 1, 1], [], []>} : vector<64x32xf32>, vector<32x96xf32>, vector<64x96xf32> -> vector<64x96xf32>
    %4 = vector.shape_cast %3 : vector<64x96xf32> to vector<2x32x96xf32>
    %c0_4 = arith.constant 0 : index
    %c0_5 = arith.constant 0 : index
    %5 = vector.load %arg5[%c0_4, %c0_5] : memref<32x32xf32, #tpu.memory_space<vmem>>, vector<32x32xf32>
    %6 = vector.extract_strided_slice %4 {offsets = [0, 0, 0], sizes = [2, 32, 8], strides = [1, 1, 1]} : vector<2x32x96xf32> to vector<2x32x8xf32>
    %7 = vector.extract_strided_slice %4 {offsets = [0, 0, 32], sizes = [2, 32, 8], strides = [1, 1, 1]} : vector<2x32x96xf32> to vector<2x32x8xf32>
    %8 = vector.extract_strided_slice %4 {offsets = [0, 0, 64], sizes = [2, 32, 8], strides = [1, 1, 1]} : vector<2x32x96xf32> to vector<2x32x8xf32>
    "tpu.trace_start"() <{level = 10 : i32, message = "btd,bsd->bts"}> : () -> ()
    %cst_6 = arith.constant dense<0.000000e+00> : vector<2x32x32xf32>
    %9 = tpu.matmul %6, %7, %cst_6 {dimension_numbers = #tpu.dot_dimension_numbers<[2], [2], [1], [1], [0, 0, 0, 1, 1, 1], [0], [0]>} : vector<2x32x8xf32>, vector<2x32x8xf32>, vector<2x32x32xf32> -> vector<2x32x32xf32>
    "tpu.trace_stop"() : () -> ()
    %cst_7 = arith.constant 0.353553385 : f32
    %10 = vector.broadcast %cst_7 : f32 to vector<2x32x32xf32>
    %11 = arith.mulf %9, %10 : vector<2x32x32xf32>
    %12 = vector.shape_cast %5 : vector<32x32xf32> to vector<1x32x32xf32>
    %13 = vector.broadcast %12 : vector<1x32x32xf32> to vector<2x32x32xf32>
    %14 = arith.addf %11, %13 : vector<2x32x32xf32>
    %cst_8 = arith.constant dense<0xFF800000> : vector<2x32xf32>
    %15 = vector.multi_reduction <maximumf>, %14, %cst_8 [2] : vector<2x32x32xf32> to vector<2x32xf32>
    %16 = vector.shape_cast %15 : vector<2x32xf32> to vector<2x32x1xf32>
    %17 = vector.broadcast %16 : vector<2x32x1xf32> to vector<2x32x32xf32>
    %18 = arith.subf %14, %17 : vector<2x32x32xf32>
    %19 = math.exp %18 : vector<2x32x32xf32>
    %cst_9 = arith.constant dense<0.000000e+00> : vector<2x32xf32>
    %20 = vector.multi_reduction <add>, %19, %cst_9 [2] : vector<2x32x32xf32> to vector<2x32xf32>
    %21 = vector.shape_cast %20 : vector<2x32xf32> to vector<2x32x1xf32>
    %22 = tpu.reciprocal %21 : vector<2x32x1xf32> -> vector<2x32x1xf32>
    %23 = vector.broadcast %22 : vector<2x32x1xf32> to vector<2x32x32xf32>
    %24 = arith.mulf %19, %23 : vector<2x32x32xf32>
    "tpu.trace_start"() <{level = 10 : i32, message = "bts,bsd->btd"}> : () -> ()
    %cst_10 = arith.constant dense<0.000000e+00> : vector<2x32x8xf32>
    %25 = tpu.matmul %24, %8, %cst_10 {dimension_numbers = #tpu.dot_dimension_numbers<[2], [1], [1], [2], [0, 0, 0, 1, 1, 2], [0], [0]>} : vector<2x32x32xf32>, vector<2x32x8xf32>, vector<2x32x8xf32> -> vector<2x32x8xf32>
    "tpu.trace_stop"() : () -> ()
    %26 = vector.shape_cast %25 : vector<2x32x8xf32> to vector<64x8xf32>
    %c0_11 = arith.constant 0 : index
    %c0_12 = arith.constant 0 : index
    %27 = vector.load %arg3[%c0_11, %c0_12] : memref<32x32xf32, #tpu.memory_space<vmem>>, vector<8x32xf32>
    %cst_13 = arith.constant dense<0.000000e+00> : vector<64x32xf32>
    %28 = tpu.matmul %26, %27, %cst_13 {dimension_numbers = #tpu.dot_dimension_numbers<[1], [0], [0], [1], [0, 0, 1, 1], [], []>} : vector<64x8xf32>, vector<8x32xf32>, vector<64x32xf32> -> vector<64x32xf32>
    %29 = vector.extract_strided_slice %4 {offsets = [0, 0, 8], sizes = [2, 32, 8], strides = [1, 1, 1]} : vector<2x32x96xf32> to vector<2x32x8xf32>
    %30 = vector.extract_strided_slice %4 {offsets = [0, 0, 40], sizes = [2, 32, 8], strides = [1, 1, 1]} : vector<2x32x96xf32> to vector<2x32x8xf32>
    %31 = vector.extract_strided_slice %4 {offsets = [0, 0, 72], sizes = [2, 32, 8], strides = [1, 1, 1]} : vector<2x32x96xf32> to vector<2x32x8xf32>
    "tpu.trace_start"() <{level = 10 : i32, message = "btd,bsd->bts"}> : () -> ()
    %cst_14 = arith.constant dense<0.000000e+00> : vector<2x32x32xf32>
    %32 = tpu.matmul %29, %30, %cst_14 {dimension_numbers = #tpu.dot_dimension_numbers<[2], [2], [1], [1], [0, 0, 0, 1, 1, 1], [0], [0]>} : vector<2x32x8xf32>, vector<2x32x8xf32>, vector<2x32x32xf32> -> vector<2x32x32xf32>
    "tpu.trace_stop"() : () -> ()
    %cst_15 = arith.constant 0.353553385 : f32
    %33 = vector.broadcast %cst_15 : f32 to vector<2x32x32xf32>
    %34 = arith.mulf %32, %33 : vector<2x32x32xf32>
    %35 = vector.shape_cast %5 : vector<32x32xf32> to vector<1x32x32xf32>
    %36 = vector.broadcast %35 : vector<1x32x32xf32> to vector<2x32x32xf32>
    %37 = arith.addf %34, %36 : vector<2x32x32xf32>
    %cst_16 = arith.constant dense<0xFF800000> : vector<2x32xf32>
    %38 = vector.multi_reduction <maximumf>, %37, %cst_16 [2] : vector<2x32x32xf32> to vector<2x32xf32>
    %39 = vector.shape_cast %38 : vector<2x32xf32> to vector<2x32x1xf32>
    %40 = vector.broadcast %39 : vector<2x32x1xf32> to vector<2x32x32xf32>
    %41 = arith.subf %37, %40 : vector<2x32x32xf32>
    %42 = math.exp %41 : vector<2x32x32xf32>
    %cst_17 = arith.constant dense<0.000000e+00> : vector<2x32xf32>
    %43 = vector.multi_reduction <add>, %42, %cst_17 [2] : vector<2x32x32xf32> to vector<2x32xf32>
    %44 = vector.shape_cast %43 : vector<2x32xf32> to vector<2x32x1xf32>
    %45 = tpu.reciprocal %44 : vector<2x32x1xf32> -> vector<2x32x1xf32>
    %46 = vector.broadcast %45 : vector<2x32x1xf32> to vector<2x32x32xf32>
    %47 = arith.mulf %42, %46 : vector<2x32x32xf32>
    "tpu.trace_start"() <{level = 10 : i32, message = "bts,bsd->btd"}> : () -> ()
    %cst_18 = arith.constant dense<0.000000e+00> : vector<2x32x8xf32>
    %48 = tpu.matmul %47, %31, %cst_18 {dimension_numbers = #tpu.dot_dimension_numbers<[2], [1], [1], [2], [0, 0, 0, 1, 1, 2], [0], [0]>} : vector<2x32x32xf32>, vector<2x32x8xf32>, vector<2x32x8xf32> -> vector<2x32x8xf32>
    "tpu.trace_stop"() : () -> ()
    %49 = vector.shape_cast %48 : vector<2x32x8xf32> to vector<64x8xf32>
    %c8 = arith.constant 8 : index
    %c0_19 = arith.constant 0 : index
    %50 = vector.load %arg3[%c8, %c0_19] : memref<32x32xf32, #tpu.memory_space<vmem>>, vector<8x32xf32>
    %cst_20 = arith.constant dense<0.000000e+00> : vector<64x32xf32>
    %51 = tpu.matmul %49, %50, %cst_20 {dimension_numbers = #tpu.dot_dimension_numbers<[1], [0], [0], [1], [0, 0, 1, 1], [], []>} : vector<64x8xf32>, vector<8x32xf32>, vector<64x32xf32> -> vector<64x32xf32>
    %52 = arith.addf %28, %51 : vector<64x32xf32>
    %53 = vector.extract_strided_slice %4 {offsets = [0, 0, 16], sizes = [2, 32, 8], strides = [1, 1, 1]} : vector<2x32x96xf32> to vector<2x32x8xf32>
    %54 = vector.extract_strided_slice %4 {offsets = [0, 0, 48], sizes = [2, 32, 8], strides = [1, 1, 1]} : vector<2x32x96xf32> to vector<2x32x8xf32>
    %55 = vector.extract_strided_slice %4 {offsets = [0, 0, 80], sizes = [2, 32, 8], strides = [1, 1, 1]} : vector<2x32x96xf32> to vector<2x32x8xf32>
    "tpu.trace_start"() <{level = 10 : i32, message = "btd,bsd->bts"}> : () -> ()
    %cst_21 = arith.constant dense<0.000000e+00> : vector<2x32x32xf32>
    %56 = tpu.matmul %53, %54, %cst_21 {dimension_numbers = #tpu.dot_dimension_numbers<[2], [2], [1], [1], [0, 0, 0, 1, 1, 1], [0], [0]>} : vector<2x32x8xf32>, vector<2x32x8xf32>, vector<2x32x32xf32> -> vector<2x32x32xf32>
    "tpu.trace_stop"() : () -> ()
    %cst_22 = arith.constant 0.353553385 : f32
    %57 = vector.broadcast %cst_22 : f32 to vector<2x32x32xf32>
    %58 = arith.mulf %56, %57 : vector<2x32x32xf32>
    %59 = vector.shape_cast %5 : vector<32x32xf32> to vector<1x32x32xf32>
    %60 = vector.broadcast %59 : vector<1x32x32xf32> to vector<2x32x32xf32>
    %61 = arith.addf %58, %60 : vector<2x32x32xf32>
    %cst_23 = arith.constant dense<0xFF800000> : vector<2x32xf32>
    %62 = vector.multi_reduction <maximumf>, %61, %cst_23 [2] : vector<2x32x32xf32> to vector<2x32xf32>
    %63 = vector.shape_cast %62 : vector<2x32xf32> to vector<2x32x1xf32>
    %64 = vector.broadcast %63 : vector<2x32x1xf32> to vector<2x32x32xf32>
    %65 = arith.subf %61, %64 : vector<2x32x32xf32>
    %66 = math.exp %65 : vector<2x32x32xf32>
    %cst_24 = arith.constant dense<0.000000e+00> : vector<2x32xf32>
    %67 = vector.multi_reduction <add>, %66, %cst_24 [2] : vector<2x32x32xf32> to vector<2x32xf32>
    %68 = vector.shape_cast %67 : vector<2x32xf32> to vector<2x32x1xf32>
    %69 = tpu.reciprocal %68 : vector<2x32x1xf32> -> vector<2x32x1xf32>
    %70 = vector.broadcast %69 : vector<2x32x1xf32> to vector<2x32x32xf32>
    %71 = arith.mulf %66, %70 : vector<2x32x32xf32>
    "tpu.trace_start"() <{level = 10 : i32, message = "bts,bsd->btd"}> : () -> ()
    %cst_25 = arith.constant dense<0.000000e+00> : vector<2x32x8xf32>
    %72 = tpu.matmul %71, %55, %cst_25 {dimension_numbers = #tpu.dot_dimension_numbers<[2], [1], [1], [2], [0, 0, 0, 1, 1, 2], [0], [0]>} : vector<2x32x32xf32>, vector<2x32x8xf32>, vector<2x32x8xf32> -> vector<2x32x8xf32>
    "tpu.trace_stop"() : () -> ()
    %73 = vector.shape_cast %72 : vector<2x32x8xf32> to vector<64x8xf32>
    %c16 = arith.constant 16 : index
    %c0_26 = arith.constant 0 : index
    %74 = vector.load %arg3[%c16, %c0_26] : memref<32x32xf32, #tpu.memory_space<vmem>>, vector<8x32xf32>
    %cst_27 = arith.constant dense<0.000000e+00> : vector<64x32xf32>
    %75 = tpu.matmul %73, %74, %cst_27 {dimension_numbers = #tpu.dot_dimension_numbers<[1], [0], [0], [1], [0, 0, 1, 1], [], []>} : vector<64x8xf32>, vector<8x32xf32>, vector<64x32xf32> -> vector<64x32xf32>
    %76 = arith.addf %52, %75 : vector<64x32xf32>
    %77 = vector.extract_strided_slice %4 {offsets = [0, 0, 24], sizes = [2, 32, 8], strides = [1, 1, 1]} : vector<2x32x96xf32> to vector<2x32x8xf32>
    %78 = vector.extract_strided_slice %4 {offsets = [0, 0, 56], sizes = [2, 32, 8], strides = [1, 1, 1]} : vector<2x32x96xf32> to vector<2x32x8xf32>
    %79 = vector.extract_strided_slice %4 {offsets = [0, 0, 88], sizes = [2, 32, 8], strides = [1, 1, 1]} : vector<2x32x96xf32> to vector<2x32x8xf32>
    "tpu.trace_start"() <{level = 10 : i32, message = "btd,bsd->bts"}> : () -> ()
    %cst_28 = arith.constant dense<0.000000e+00> : vector<2x32x32xf32>
    %80 = tpu.matmul %77, %78, %cst_28 {dimension_numbers = #tpu.dot_dimension_numbers<[2], [2], [1], [1], [0, 0, 0, 1, 1, 1], [0], [0]>} : vector<2x32x8xf32>, vector<2x32x8xf32>, vector<2x32x32xf32> -> vector<2x32x32xf32>
    "tpu.trace_stop"() : () -> ()
    %cst_29 = arith.constant 0.353553385 : f32
    %81 = vector.broadcast %cst_29 : f32 to vector<2x32x32xf32>
    %82 = arith.mulf %80, %81 : vector<2x32x32xf32>
    %83 = vector.shape_cast %5 : vector<32x32xf32> to vector<1x32x32xf32>
    %84 = vector.broadcast %83 : vector<1x32x32xf32> to vector<2x32x32xf32>
    %85 = arith.addf %82, %84 : vector<2x32x32xf32>
    %cst_30 = arith.constant dense<0xFF800000> : vector<2x32xf32>
    %86 = vector.multi_reduction <maximumf>, %85, %cst_30 [2] : vector<2x32x32xf32> to vector<2x32xf32>
    %87 = vector.shape_cast %86 : vector<2x32xf32> to vector<2x32x1xf32>
    %88 = vector.broadcast %87 : vector<2x32x1xf32> to vector<2x32x32xf32>
    %89 = arith.subf %85, %88 : vector<2x32x32xf32>
    %90 = math.exp %89 : vector<2x32x32xf32>
    %cst_31 = arith.constant dense<0.000000e+00> : vector<2x32xf32>
    %91 = vector.multi_reduction <add>, %90, %cst_31 [2] : vector<2x32x32xf32> to vector<2x32xf32>
    %92 = vector.shape_cast %91 : vector<2x32xf32> to vector<2x32x1xf32>
    %93 = tpu.reciprocal %92 : vector<2x32x1xf32> -> vector<2x32x1xf32>
    %94 = vector.broadcast %93 : vector<2x32x1xf32> to vector<2x32x32xf32>
    %95 = arith.mulf %90, %94 : vector<2x32x32xf32>
    "tpu.trace_start"() <{level = 10 : i32, message = "bts,bsd->btd"}> : () -> ()
    %cst_32 = arith.constant dense<0.000000e+00> : vector<2x32x8xf32>
    %96 = tpu.matmul %95, %79, %cst_32 {dimension_numbers = #tpu.dot_dimension_numbers<[2], [1], [1], [2], [0, 0, 0, 1, 1, 2], [0], [0]>} : vector<2x32x32xf32>, vector<2x32x8xf32>, vector<2x32x8xf32> -> vector<2x32x8xf32>
    "tpu.trace_stop"() : () -> ()
    %97 = vector.shape_cast %96 : vector<2x32x8xf32> to vector<64x8xf32>
    %c24 = arith.constant 24 : index
    %c0_33 = arith.constant 0 : index
    %98 = vector.load %arg3[%c24, %c0_33] : memref<32x32xf32, #tpu.memory_space<vmem>>, vector<8x32xf32>
    %cst_34 = arith.constant dense<0.000000e+00> : vector<64x32xf32>
    %99 = tpu.matmul %97, %98, %cst_34 {dimension_numbers = #tpu.dot_dimension_numbers<[1], [0], [0], [1], [0, 0, 1, 1], [], []>} : vector<64x8xf32>, vector<8x32xf32>, vector<64x32xf32> -> vector<64x32xf32>
    %100 = arith.addf %76, %99 : vector<64x32xf32>
    %c0_35 = arith.constant 0 : index
    %c0_36 = arith.constant 0 : index
    %101 = vector.load %arg4[%c0_35, %c0_36] : memref<1x32xf32, #tpu.memory_space<vmem>>, vector<1x32xf32>
    %102 = vector.broadcast %101 : vector<1x32xf32> to vector<64x32xf32>
    %103 = arith.addf %100, %102 : vector<64x32xf32>
    %104 = vector.shape_cast %103 : vector<64x32xf32> to vector<2x32x32xf32>
    %c0_37 = arith.constant 0 : index
    %c0_38 = arith.constant 0 : index
    %c0_39 = arith.constant 0 : index
    %105 = vector.load %arg6[%c0_37, %c0_38, %c0_39] : memref<2x32x32xf32, #tpu.memory_space<vmem>>, vector<2x32x32xf32>
    tpu.vector_store %arg6[%c0_37, %c0_38, %c0_39], %104 {strides = array<i32>} : memref<2x32x32xf32, #tpu.memory_space<vmem>>, vector<2x32x32xf32>,
    return
  }
  func.func @transform_0(%arg0: i32) -> (i32, i32, i32) {
    %c0_i32 = arith.constant 0 : i32
    %c0_i32_0 = arith.constant 0 : i32
    %c0_i32_1 = arith.constant 0 : i32
    return %arg0, %c0_i32, %c0_i32_0 : i32, i32, i32
  }
  func.func @transform_1(%arg0: i32) -> (i32, i32) {
    %c0_i32 = arith.constant 0 : i32
    %c0_i32_0 = arith.constant 0 : i32
    %c0_i32_1 = arith.constant 0 : i32
    return %c0_i32, %c0_i32_0 : i32, i32
  }
  func.func @transform_2(%arg0: i32) -> (i32, i32) {
    %c0_i32 = arith.constant 0 : i32
    %c0_i32_0 = arith.constant 0 : i32
    %c0_i32_1 = arith.constant 0 : i32
    return %c0_i32, %c0_i32_0 : i32, i32
  }
  func.func @transform_3(%arg0: i32) -> (i32, i32) {
    %c0_i32 = arith.constant 0 : i32
    %c0_i32_0 = arith.constant 0 : i32
    %c0_i32_1 = arith.constant 0 : i32
    return %c0_i32, %c0_i32_0 : i32, i32
  }
  func.func @transform_4(%arg0: i32) -> (i32, i32) {
    %c0_i32 = arith.constant 0 : i32
    %c0_i32_0 = arith.constant 0 : i32
    %c0_i32_1 = arith.constant 0 : i32
    return %c0_i32, %c0_i32_0 : i32, i32
  }
  func.func @transform_5(%arg0: i32) -> (i32, i32, i32) {
    %c0_i32 = arith.constant 0 : i32
    %c0_i32_0 = arith.constant 0 : i32
    %c0_i32_1 = arith.constant 0 : i32
    return %arg0, %c0_i32, %c0_i32_0 : i32, i32, i32
  }
}

</mosaic_0001>

<bundles_post_ra>
// kernel: tpu_custom_call.1
= control target key start
LH: loop header
LB: loop body
LE: loop exit
PB: predicated region body
PF: predicated region fallthrough
CT: control target
= control target key end

     0   :  { %10 = vsyncpa [#allocation3], 0  ;;  %s5663_s0 = inlined_call_operand.hbm [shape: f32[4,32,32], index: 0, kind: input, shape index: {}]   ;;  %s5664_s1 = inlined_call_operand.hbm [shape: f32[32,96], index: 1, kind: input, shape index: {}]   ;;  %s5665_s2 = inlined_call_operand.hbm [shape: f32[32,32], index: 2, kind: input, shape index: {}]   ;;  %s5666_s3 = inlined_call_operand.vmem [shape: f32[1,32], index: 3, kind: input, shape index: {}]   ;;  %s5667_s4 = inlined_call_operand.hbm [shape: f32[32,32], index: 4, kind: input, shape index: {}]   ;;  %s5668_s5 = inlined_call_operand.hbm [shape: f32[4,32,32], index: 5, kind: output, shape index: {}]  }
   0x1   :  { %12 = vsyncpa [#allocation3 + $0x1], 0 }
   0x2   :  { %13 = vsyncpa [#allocation6], 0 }
   0x3   :  { %14 = vsyncpa [#allocation9], 0 }
   0x4   :  { %15 = vsyncpa [#allocation4], 0 }
   0x5   :  { %17 = vsyncpa [#allocation4 + $0x1], 0  ;;  %s4784_s18 = smov 0   ;;  %s4786_s19 = smov 0  }
   0x6   :  { %s4788_s20 = smov 0   ;;  %s4790_s21 = smov 0  }
   0x7 LB: > { %s4805_s22 = sadd.s32 4294967295, %s4732_s21   ;;  %s3329_s23 = sadd.s32 4294967294, %s4732_s21   ;;  %s4732_s21 = sphi %s4790_s21, %s5693_s21   ;;  %s4728_s20 = sphi %s4788_s20, %s5692_s20   ;;  %s4724_s19 = sphi %s4786_s19, %s5691_s19   ;;  %s4720_s18 = sphi %s4784_s18, %s5690_s18  }
   0x8   : > { %p43_p0 = scmp.ne.s32.totalorder %s4724_s19, %s4720_s18  ;;  %p5669_p1 = scmp.eq.s32.totalorder %s4805_s22, 0 }
   0x9   : > { %p157_p3 = scmp.eq.s32.totalorder %s3329_s23, 1  ;;  %p3330_p5 = scmp.ge.s32.totalorder %s4732_s21, 1 }
   0xa   : > { %p4814_p4 = por %p5669_p1, %p43_p0  ;;  %p164_p7 = scmp.lt.s32.totalorder %s4732_s21, 3 }
   0xb   : > { %p4819_p6 = por %p157_p3, %p43_p0  ;;  %s4734_s27 = smov [#allocation5]  }
   0xc   : > { %s5672_s24 = scalar_select %p4814_p4, 1, 0 }
   0xd   : > { %s5673_s25 = scalar_select %p4819_p6, 1, 0 }
   0xe   : > { %p4824_p8 = pnand %p3330_p5, %p164_p7  ;;  %s176_s28 = sshll.u32 %s4734_s27, 4  ;;  %s4828_s28 = int_to_ptr.vmem [resolvable:$true] %s176_s28 }
   0xf   : > { %s4735_s30 = smov [#allocation7]   ;;  %s4736_s7 = smov [#allocation8]  }
  0x10   : > { %s5674_s26 = scalar_select %p4824_p8, 1, 0 }
  0x11   : > { %p4176_p9 = pneg %p4824_p8  ;;  %s189_s6 = sshll.u32 %s4735_s30, 4  ;;  %s4839_s6 = int_to_ptr.vmem [resolvable:$true] %s189_s6 }
  0x12   : > { %s4841_s8 = sshll.u32 %s4736_s7, 4  ;;  %s4544_s11 = scalar_lea.hbm %s5664_s1, 512  ;;  %s206_s8 = int_to_ptr.vmem [resolvable:$true] %s4841_s8 }
  0x13   : > { %p4835_p11 = pnand %p4176_p9, %p5669_p1  ;;  %p4545_p12 = scmp.ne.s32.totalorder %s5664_s1, %s4544_s11 }
  0x14   : > { %p4551_p5 = scmp.lt.u32.totalorder %s4544_s11, %s5664_s1 }
  0x15   : > { %p4851_p13 = pneg %p4835_p11 }
  0x17   : > { %p4547_p0 = pnand %p4851_p13, %p4545_p12 }
  0x19   : > { %p4548_p3 = pneg %p4547_p0 }
  0x1b   : > { %p4553_p7 = pnand %p4551_p5, %p4548_p3 }
  0x1d   : > { %4556 = shalt.err (!%p4553_p7)
}
  0x1e   : > { %s4557_s17 = scalar_lea.vmem %s4828_s28, 512  ;;  %p4565_p2 = scmp.lt.s32.totalorder %s4828_s28, %s4828_s28 }
  0x1f   : > { %p4558_p9 = scmp.ne.s32.totalorder %s4828_s28, %s4557_s17  ;;  %p4566_p6 = scmp.lt.s32.totalorder %s4557_s17, %s4557_s17 }
  0x21   : > { %p4560_p10 = pnand %p4558_p9, %p4851_p13  ;;  %p4567_p12 = por %p4566_p6, %p4565_p2 }
  0x23   : > { %p4561_p1 = pneg %p4560_p10 }
  0x25   : > { %p4568_p0 = pnand %p4567_p12, %p4561_p1 }
  0x27   : > { %4571 = shalt.err (!%p4568_p0)
}
  0x28   : > { %s4737_s23 = smov 128   ;;  %s4738_s27 = smov 8  }
  0x29   : > { %4179 = dma.hbm_to_vmem [thread:$0]  (!%p4835_p11), %s5664_s1, 512, %s4828_s28, [#allocation6], %s4737_s23, %s4737_s23, %s4738_s27  }
  0x2a   : > { %s4572_s11 = scalar_lea.hbm %s5665_s2, 512 }
  0x2b   : > { %p4573_p1 = scmp.ne.s32.totalorder %s5665_s2, %s4572_s11  ;;  %p4579_p10 = scmp.lt.u32.totalorder %s4572_s11, %s5665_s2 }
  0x2d   : > { %p4575_p2 = pnand %p4573_p1, %p4851_p13 }
  0x2f   : > { %p4576_p6 = pneg %p4575_p2 }
  0x31   : > { %p4581_p3 = pnand %p4579_p10, %p4576_p6 }
  0x33   : > { %4584 = shalt.err (!%p4581_p3)
}
  0x34   : > { %s4585_s28 = scalar_lea.vmem %s4839_s6, 512  ;;  %p4593_p12 = scmp.lt.s32.totalorder %s4839_s6, %s4839_s6 }
  0x35   : > { %p4586_p5 = scmp.ne.s32.totalorder %s4839_s6, %s4585_s28  ;;  %p4594_p0 = scmp.lt.s32.totalorder %s4585_s28, %s4585_s28 }
  0x37   : > { %p4588_p7 = pnand %p4586_p5, %p4851_p13  ;;  %p4595_p1 = por %p4594_p0, %p4593_p12 }
  0x39   : > { %p4589_p9 = pneg %p4588_p7 }
  0x3b   : > { %p4596_p2 = pnand %p4595_p1, %p4589_p9 }
  0x3d   : > { %4599 = shalt.err (!%p4596_p2)
}
  0x3e   : > { %4182 = dma.hbm_to_vmem [thread:$0]  (!%p4835_p11), %s5665_s2, 512, %s4839_s6, [#allocation6], %s4737_s23, %s4737_s23, %s4738_s27  }
  0x3f   : > { %s4600_s10 = scalar_lea.hbm %s5667_s4, 512 }
  0x40   : > { %p4601_p6 = scmp.ne.s32.totalorder %s5667_s4, %s4600_s10  ;;  %p4607_p5 = scmp.lt.u32.totalorder %s4600_s10, %s5667_s4 }
  0x42   : > { %p4603_p10 = pnand %p4601_p6, %p4851_p13 }
  0x44   : > { %p4604_p3 = pneg %p4603_p10 }
  0x46   : > { %p4609_p7 = pnand %p4607_p5, %p4604_p3 }
  0x48   : > { %4612 = shalt.err (!%p4609_p7)
}
  0x49   : > { %s4613_s16 = scalar_lea.vmem %s206_s8, 512  ;;  %p4621_p1 = scmp.lt.s32.totalorder %s206_s8, %s206_s8 }
  0x4a   : > { %p4614_p9 = scmp.ne.s32.totalorder %s206_s8, %s4613_s16  ;;  %p4622_p2 = scmp.lt.s32.totalorder %s4613_s16, %s4613_s16 }
  0x4c   : > { %p4616_p12 = pnand %p4614_p9, %p4851_p13  ;;  %p4623_p4 = por %p4622_p2, %p4621_p1 }
  0x4e   : > { %p4617_p0 = pneg %p4616_p12 }
  0x50   : > { %p4624_p8 = pnand %p4623_p4, %p4617_p0 }
  0x52   : > { %4627 = shalt.err (!%p4624_p8)
}
  0x53   : > { %4185 = dma.hbm_to_vmem [thread:$0]  (!%p4835_p11), %s5667_s4, 512, %s206_s8, [#allocation9], %s4737_s23, %s4737_s23, %s4738_s27  }
  0x54   : > { %s4924_s14 = sadd.s32 1, %s4732_s21   ;;  %s30_s17 = sadd.s32 1, %s4728_s20 }
  0x55   : > { %s27_s29 = ssub.s32 %s4732_s21, %s4924_s14  ;;  %p37_p8 = scmp.ne.s32.totalorder %s4728_s20, %s4724_s19 }
  0x56   : > { %p28_p4 = scmp.eq.s32.totalorder %s27_s29, 0  ;;  %p38_p13 = scmp.eq.s32.totalorder %s4732_s21, 0 }
  0x57   : > { %p4197_p6 = scmp.lt.s32.totalorder %s4732_s21, 2  ;;  %p5677_p3 = scmp.eq.s32.totalorder %s4805_s22, 1 }
  0x58   : > { %s4934_s30 = scalar_select %p28_p4, %s4728_s20, %s30_s17  }
  0x59   : > { %p39_p10 = por %p38_p13, %p37_p8  ;;  %p4938_p5 = por %p5677_p3, %p37_p8 }
  0x5a   : > { %s219_s9 = sand.u32 1, %s4728_s20   ;;  %s3489_s10 = sshll.u32 %s4732_s21, 10 }
  0x5b   : > { %s3335_s8 = sshll.u32 %s219_s9, 6  ;;  %s4947_s13 = scalar_lea.hbm %s5663_s0, %s3489_s10 }
  0x5c   : > { %s223_s15 = scalar_lea.vmem [#allocation2], %s3335_s8  ;;  %p4949_p11 = pnand %p4197_p6, %p39_p10 }
  0x5d   : > { %s231_s16 = sshll.u32 %s223_s15, 4  ;;  %s4955_s28 = scalar_lea.sflag [#allocation3], %s219_s9  ;;  %s4953_s16 = int_to_ptr.vmem [resolvable:$true] %s231_s16 }
  0x5e   : > { %s4628_s29 = scalar_lea.hbm %s4947_s13, 1024  ;;  %p4630_p9 = pneg %p4949_p11 }
  0x5f   : > { %p4629_p7 = scmp.ne.s32.totalorder %s4947_s13, %s4628_s29  ;;  %s4633_s8 = scalar_lea.hbm %s5663_s0, 2048 }
  0x60   : > { %p4634_p1 = scmp.lt.u32.totalorder %s4947_s13, %s5663_s0  ;;  %p4635_p2 = scmp.lt.u32.totalorder %s4633_s8, %s4628_s29 }
  0x61   : > { %p4631_p12 = pnand %p4630_p9, %p4629_p7  ;;  %p4637_p8 = scmp.lt.u32.totalorder %s4628_s29, %s4947_s13 }
  0x62   : > { %p4636_p4 = por %p4635_p2, %p4634_p1 }
  0x63   : > { %p4632_p0 = pneg %p4631_p12 }
  0x64   : > { %p4638_p13 = por %p4637_p8, %p4636_p4 }
  0x66   : > { %p4639_p6 = pnand %p4638_p13, %p4632_p0 }
  0x68   : > { %4642 = shalt.err (!%p4639_p6)
}
  0x69   : > { %s4643_s9 = scalar_lea.vmem %s4953_s16, 1024  ;;  %s4739_s15 = smov [#allocation2]  }
  0x6a   : > { %p4644_p10 = scmp.ne.s32.totalorder %s4953_s16, %s4643_s9  ;;  %s4648_s17 = sshll.u32 %s4739_s15, 4  ;;  %s4649_s17 = int_to_ptr.vmem [resolvable:$false] %s4648_s17 }
  0x6b   : > { %s4650_s10 = scalar_lea.vmem %s4649_s17, 2048  ;;  %p4651_p12 = scmp.lt.s32.totalorder %s4953_s16, %s4649_s17 }
  0x6c   : > { %p4646_p3 = pnand %p4644_p10, %p4630_p9  ;;  %p4652_p1 = scmp.lt.s32.totalorder %s4650_s10, %s4643_s9 }
  0x6e   : > { %p4647_p7 = pneg %p4646_p3  ;;  %p4653_p2 = por %p4652_p1, %p4651_p12 }
  0x70   : > { %p4654_p4 = pnand %p4653_p2, %p4647_p7 }
  0x72   : > { %4657 = shalt.err (!%p4654_p4)
}
  0x73   : > { %4189 = dma.hbm_to_vmem [thread:$0]  (!%p4949_p11), %s4947_s13, 1024, %s4953_s16, %s4955_s28, %s4737_s23, %s4737_s23, %s4738_s27  }
  0x74   : > { %p5680_p9 = scmp.ne.s32.totalorder %s5674_s26, 0 }
  0x75   : > { %s4989_s29 = sand.u32 (!%p5680_p9), 1, %s4724_s19   ;;  %p5681_p0 = scmp.ne.s32.totalorder (!%p5680_p9), %s5672_s24, 0 }
  0x76   : > { %243 = sbr.rel (%p5680_p9) target bundleno = 3544 (0xdd8), region = 40  ;;  %s3340_s8 = sshll.u32 (!%p5680_p9), %s4989_s29, 6 }
  0x77   : > { %s246_s11 = scalar_lea.sflag (!%p5680_p9), [#allocation3], %s4989_s29  ;;  %s4995_s6 = scalar_lea.vmem (!%p5680_p9), [#allocation2], %s3340_s8 }
  0x7d   : > { %4703 = dma.done.wait (%p5681_p0), %s246_s11, 1024  }
  0x7e   : > { %4705 = vsyncadd (%p5681_p0), %s246_s11, 4294966272  ;;  %p5682_p11 = scmp.eq.s32.totalorder %s4805_s22, 0 }
  0x80   : > { %4707 = dma.done.wait (%p5682_p11), [#allocation6], 1024   ;;  %p5683_p8 = pmov %p5682_p11 }
  0x82   : > { %4709 = vsyncadd (%p5683_p8), [#allocation6], 4294966272  ;;  %p5684_p13 = pmov %p5683_p8 }
  0x83   : > { %p5685_p6 = pmov %p5683_p8 }
  0x84   : > { %4711 = dma.done.wait (%p5684_p13), [#allocation9], 512  }
  0x85   : > { %4713 = vsyncadd (%p5685_p6), [#allocation9], 4294966784  ;;  %vm302_vm0 = vcmask 261120   ;;  %v298_v0 = vld [vmem:[#allocation5] sm:$0xff]  ;;  %v299_v1 = vld [vmem:[#allocation5 + $0x8] sm:$0xff]  ;;  %vm448_vm1 = vcmask 64512  }
  0x86   : > { %v300_v2 = vld [vmem:[#allocation5 + $0x10] sm:$0xff]  ;;  %v3968_v3 = vpack.c.bf16 %v299_v1, %v298_v0  ;;  %v301_v4 = vld [vmem:[#allocation5 + $0x18] sm:$0xff]  ;;  %v290_v5 = vld [vmem:[%s4995_s6] sm:$0xff]  ;;  %s4740_s24 = smov 96   ;;  %s4741_s26 = smov 64  }
  0x87   : > { %v3972_v6 = vpack.c.bf16 %v301_v4, %v300_v2  ;;  %3676 = vmatprep.mubr.msk.f32.mxu0 %vm302_vm0, %v290_v5  ;;  %v291_v7 = vld [vmem:[%s4995_s6 + $0x8] sm:$0xff]  ;;  %v292_v8 = vld [vmem:[%s4995_s6 + $0x10] sm:$0xff]  ;;  %v293_v9 = vld [vmem:[%s4995_s6 + $0x18] sm:$0xff]  ;;  %s4742_s23 = smov 88   ;;  %s4743_s27 = smov 120  }
  0x88   : > { %3969 = vmatprep.subr.bf16.mxu0 %v3968_v3  ;;  %v294_v10 = vld [vmem:[%s4995_s6 + $0x20] sm:$0xff]  ;;  %v295_v11 = vld [vmem:[%s4995_s6 + $0x28] sm:$0xff]  ;;  %v296_v12 = vld [vmem:[%s4995_s6 + $0x30] sm:$0xff]  ;;  %s4744_s13 = smov 56   ;;  %s4745_s16 = smov 80  }
  0x89   : > { %3971 = vmatpush3.bf16.msra.mxu0 %v3968_v3  ;;  %v297_v13 = vld [vmem:[%s4995_s6 + $0x38] sm:$0xff]  ;;  %vm5069_vm2 = vmpackc.low %vm448_vm1, %vm448_vm1  ;;  %v5101_v48 = vld [vmem:[#allocation8 + $0x8] sm:$0xff]  ;;  %s4746_s28 = smov 112   ;;  %s4747_s12 = smov 48  }
  0x8a   : > { %3973 = vmatprep.subr.bf16.mxu0 %v3972_v6  ;;  %v5103_v51 = vld [vmem:[#allocation8] sm:$0xff]  ;;  %v5107_v56 = vld [vmem:[#allocation8 + $0x18] sm:$0xff]  ;;  %v5112_v63 = vld [vmem:[#allocation8 + $0x10] sm:$0xff]  ;;  %s4748_s9 = smov 72   ;;  %s4749_s15 = smov 104  }
  0x8b   : > { %s4750_s17 = smov 40   ;;  %s287_s6 = scalar_lea.vmem [#allocation10], %s3340_s8 }
  0x8c   : > { %s3227_s8 = sshll.u32 %s287_s6, 4  ;;  %s5617_s8 = int_to_ptr.vmem [resolvable:$true] %s3227_s8 }
  0x8d   : > { %3975 = vmatpush3.bf16.msra.mxu0 %v3972_v6 }
  0x90   : > { %3677 = vmatmul.mubr.msk.f32.vlgmr.msra.gmra.mrb[0].mxu0 %vm302_vm0, %v291_v7 }
  0x91   : > { %3679 = vmatprep.mubr.msk.f32.mxu0 %vm302_vm0, %v292_v8 }
  0x94   : > { %3680 = vmatmul.mubr.msk.f32.gmra.mrb[2].mxu0 %vm302_vm0, %v293_v9 }
  0x95   : > { %3682 = vmatprep.mubr.msk.f32.mxu0 %vm302_vm0, %v294_v10 }
  0x98   : > { %3683 = vmatmul.mubr.msk.f32.gmra.mrb[4].mxu0 %vm302_vm0, %v295_v11 }
  0x99   : > { %3685 = vmatprep.mubr.msk.f32.mxu0 %vm302_vm0, %v296_v12 }
  0x9c   : > { %3686 = vmatmul.mubr.msk.f32.gmra.mrb[6].mxu0 %vm302_vm0, %v297_v13 }
 0x163   : > { %v5025_v14 = vpop.f32.mrb[0].mxu0 }
 0x164   : > { %v5027_v15 = vpop.f32.mrb[1].mxu0 }
 0x165   : > { %3696 = vmatprep.mubr.msk.f32.mxu1 %vm448_vm1, %v5027_v15  ;;  %v5033_v16 = vpack.i.bf16 %v5025_v14, %v5027_v15 }
 0x167   : > { %4253 = vrot.lane.b32.xlu0 %v5033_v16, %s4740_s24  ;;  %v5036_v17 = vpop.f32.mrb[2].mxu0 }
 0x168   : > { %v5038_v18 = vpop.f32.mrb[3].mxu0 }
 0x169   : > { %v5042_v19 = vpack.i.bf16 %v5036_v17, %v5038_v18 }
 0x16b   : > { %v5044_v20 = vpop.f32.mrb[4].mxu0  ;;  %4258 = vrot.lane.b32.xlu0 %v5042_v19, %s4740_s24 }
 0x16c   : > { %v5047_v21 = vpop.f32.mrb[5].mxu0 }
 0x16d   : > { %v5051_v22 = vpack.i.bf16 %v5044_v20, %v5047_v21  ;;  %3710 = vmatprep.mubr.msk.f32.mxu0 %vm448_vm1, %v5047_v21 }
 0x16f   : > { %4263 = vrot.lane.b32.xlu1 %v5051_v22, %s4740_s24  ;;  %v5056_v23 = vpop.f32.mrb[6].mxu0 }
 0x170   : > { %v5058_v24 = vpop.f32.mrb[7].mxu0 }
 0x171   : > { %v5062_v25 = vpack.i.bf16 %v5056_v23, %v5058_v24 }
 0x173   : > { %4268 = vrot.lane.b32.xlu1 %v5062_v25, %s4740_s24  ;;  %s3491_s24 = sshll.u32 %s4805_s22, 10  ;;  %s3213_s22 = scalar_lea.sflag [#allocation4], %s4989_s29 }
 0x177   : > { %4273 = vrot.lane.b32.xlu1 %v5033_v16, %s4741_s26 }
 0x1d9   : > { %v4254_v26 = vpop.permute.xlu0 %4253 }
 0x1da   : > { %v4256_v27 = vunpack.i.h.bf16 %v4254_v26  ;;  %v4255_v28 = vunpack.i.l.bf16 %v4254_v26 }
 0x1dc   : > { %v3976_v30 = vpack.c.bf16 %v4256_v27, %v4255_v28 }
 0x1dd   : > { %v4259_v31 = vpop.permute.xlu0 %4258 }
 0x1de   : > { %3978 = vmatprep.subr.msk.bf16.mxu1 %vm5069_vm2, %v3976_v30  ;;  %v4261_v32 = vunpack.i.h.bf16 %v4259_v31  ;;  %v4260_v33 = vunpack.i.l.bf16 %v4259_v31 }
 0x1df   : > { %3981 = vmatpush3.bf16.xpose.msk.msra.mxu1 %vm5069_vm2, %v3976_v30 }
 0x1e0   : > { %v3982_v34 = vpack.c.bf16 %v4261_v32, %v4260_v33 }
 0x1e1   : > { %v4264_v35 = vpop.permute.xlu1 %4263 }
 0x1e2   : > { %v4266_v36 = vunpack.i.h.bf16 %v4264_v35  ;;  %v4265_v37 = vunpack.i.l.bf16 %v4264_v35  ;;  %3984 = vmatprep.subr.msk.bf16.mxu1 %vm5069_vm2, %v3982_v34 }
 0x1e4   : > { %v3988_v38 = vpack.c.bf16 %v4266_v36, %v4265_v37 }
 0x1e5   : > { %v4269_v39 = vpop.permute.xlu1 %4268 }
 0x1e6   : > { %v4271_v40 = vunpack.i.h.bf16 %v4269_v39  ;;  %v4270_v41 = vunpack.i.l.bf16 %v4269_v39  ;;  %3990 = vmatprep.subr.msk.bf16.mxu0 %vm5069_vm2, %v3988_v38 }
 0x1e7   : > { %3987 = vmatpush3.bf16.xpose.msk.msra.mxu1 %vm5069_vm2, %v3982_v34  ;;  %3993 = vmatpush3.bf16.xpose.msk.msra.mxu0 %vm5069_vm2, %v3988_v38 }
 0x1e8   : > { %v3994_v42 = vpack.c.bf16 %v4271_v40, %v4270_v41 }
 0x1e9   : > { %v4274_v43 = vpop.permute.xlu1 %4273 }
 0x1ea   : > { %v4276_v44 = vunpack.i.h.bf16 %v4274_v43  ;;  %v4275_v45 = vunpack.i.l.bf16 %v4274_v43  ;;  %3996 = vmatprep.subr.msk.bf16.mxu0 %vm5069_vm2, %v3994_v42 }
 0x1ec   : > { %v4000_v46 = vpack.c.bf16 %v4276_v44, %v4275_v45 }
 0x1ee   : > { %3697 = vmatmul.mubr.msk.f32.vlgmr.msra.gmra.mrb[0].mxu1 %vm448_vm1, %v5025_v14 }
 0x1ef   : > { %3699 = vmatprep.mubr.msk.f32.mxu1 %vm448_vm1, %v5038_v18  ;;  %3999 = vmatpush3.bf16.xpose.msk.msra.mxu0 %vm5069_vm2, %v3994_v42 }
 0x1f0   : > { %4001 = vmatprep.subr.bf16.mxu0 %v4000_v46 }
 0x1f2   : > { %3700 = vmatmul.mubr.msk.f32.gmra.mrb[2].mxu1 %vm448_vm1, %v5036_v17 }
 0x1f6   : > { %3711 = vmatmul.mubr.msk.f32.vlgmr.msra.gmra.mrb[8].mxu0 %vm448_vm1, %v5044_v20 }
 0x1f7   : > { %3713 = vmatprep.mubr.msk.f32.mxu0 %vm448_vm1, %v5058_v24  ;;  %4003 = vmatpush3.bf16.msra.mxu0 %v4000_v46 }
 0x1fa   : > { %3714 = vmatmul.mubr.msk.f32.gmra.mrb[10].mxu0 %vm448_vm1, %v5056_v23 }
 0x2c1   : > { %v3698_v47 = vpop.f32.mrb[0].mxu1 }
 0x2c2   : > { %v664_v49 = vmul.f32 0.35355338, %v3698_v47  ;;  %v531_v50 = vpop.f32.mrb[1].mxu1 }
 0x2c3   : > { %v663_v52 = vmul.f32 0.35355338, %v531_v50 }
 0x2c4   : > { %v672_v53 = vadd.f32 %v664_v49, %v5101_v48 }
 0x2c5   : > { %v3701_v54 = vpop.f32.mrb[2].mxu1  ;;  %v671_v55 = vadd.f32 %v663_v52, %v5103_v51 }
 0x2c6   : > { %v666_v57 = vmul.f32 0.35355338, %v3701_v54  ;;  %v541_v58 = vpop.f32.mrb[3].mxu1  ;;  %v682_v59 = vsel %vm302_vm0, %v672_v53, -inf }
 0x2c7   : > { %v665_v60 = vmul.f32 0.35355338, %v541_v58  ;;  %683 = vmax.xlane.f32.xlu1 %v682_v59  ;;  %v679_v61 = vsel %vm302_vm0, %v671_v55, -inf }
 0x2c8   : > { %680 = vmax.xlane.f32.xlu0 %v679_v61  ;;  %v674_v62 = vadd.f32 %v666_v57, %v5107_v56 }
 0x2c9   : > { %v3712_v0 = vpop.f32.mrb[8].mxu0  ;;  %v673_v5 = vadd.f32 %v665_v60, %v5112_v63 }
 0x2ca   : > { %v644_v1 = vpop.f32.mrb[9].mxu0  ;;  %v688_v2 = vsel %vm302_vm0, %v674_v62, -inf  ;;  %v668_v3 = vmul.f32 0.35355338, %v3712_v0 }
 0x2cb   : > { %v667_v4 = vmul.f32 0.35355338, %v644_v1  ;;  %v685_v10 = vsel %vm302_vm0, %v673_v5, -inf }
 0x2cc   : > { %689 = vmax.xlane.f32.xlu0 %v688_v2  ;;  %v676_v12 = vadd.f32 %v668_v3, %v5101_v48 }
 0x2cd   : > { %v3715_v6 = vpop.f32.mrb[10].mxu0  ;;  %v5117_v7 = vadd.f32 %v667_v4, %v5103_v51 }
 0x2ce   : > { %v654_v8 = vpop.f32.mrb[11].mxu0  ;;  %v670_v9 = vmul.f32 0.35355338, %v3715_v6  ;;  %v694_v13 = vsel %vm302_vm0, %v676_v12, -inf }
 0x2cf   : > { %v691_v11 = vsel %vm302_vm0, %v5117_v7, -inf  ;;  %v669_v28 = vmul.f32 0.35355338, %v654_v8 }
 0x2d0   : > { %686 = vmax.xlane.f32.xlu0 %v685_v10  ;;  %692 = vmax.xlane.f32.xlu1 %v691_v11  ;;  %v5125_v26 = vadd.f32 %v670_v9, %v5107_v56 }
 0x2d1   : > { %v5134_v30 = vadd.f32 %v669_v28, %v5112_v63 }
 0x2d2   : > { %v700_v27 = vsel %vm302_vm0, %v5125_v26, -inf }
 0x2d3   : > { %v697_v31 = vsel %vm302_vm0, %v5134_v30, -inf }
 0x2d4   : > { %695 = vmax.xlane.f32.xlu0 %v694_v13 }
 0x2d8   : > { %701 = vmax.xlane.f32.xlu0 %v700_v27 }
 0x2e1   : > { %4283 = vrot.lane.b32.xlu1 %v5051_v22, %s4741_s26 }
 0x2ee   : > { %4278 = vrot.lane.b32.xlu0 %v5042_v19, %s4741_s26 }
 0x305   : > { %698 = vmax.xlane.f32.xlu1 %v697_v31 }
 0x354   : > { %v684_v32 = vpop.xlane.xlu1 %683 }
 0x355   : > { %v704_v33 = vsub.f32 %v672_v53, %v684_v32  ;;  %v681_v34 = vpop.xlane.xlu0 %680 }
 0x356   : > { %v703_v35 = vsub.f32 %v671_v55, %v681_v34 }
 0x357   : > { %v713_v36 = vmul.f32 1.442695, %v704_v33 }
 0x358   : > { %v711_v37 = vmul.f32 1.442695, %v703_v35 }
 0x359   : > { %4412 = vpow2.f32 %v713_v36  ;;  %v690_v38 = vpop.xlane.xlu0 %689 }
 0x35a   : > { %4414 = vpow2.f32 %v711_v37  ;;  %v706_v39 = vsub.f32 %v674_v62, %v690_v38 }
 0x35c   : > { %v717_v40 = vmul.f32 1.442695, %v706_v39 }
 0x35d   : > { %v687_v41 = vpop.xlane.xlu0 %686  ;;  %v693_v44 = vpop.xlane.xlu1 %692 }
 0x35e   : > { %4416 = vpow2.f32 %v717_v40  ;;  %v705_v42 = vsub.f32 %v673_v5, %v687_v41  ;;  %v707_v8 = vsub.f32 %v5117_v7, %v693_v44 }
 0x360   : > { %v715_v43 = vmul.f32 1.442695, %v705_v42  ;;  %v719_v9 = vmul.f32 1.442695, %v707_v8 }
 0x361   : > { %v696_v45 = vpop.xlane.xlu0 %695  ;;  %v4284_v55 = vpop.permute.xlu1 %4283 }
 0x362   : > { %4418 = vpow2.f32 %v715_v43  ;;  %v708_v46 = vsub.f32 %v676_v12, %v696_v45  ;;  %v4286_v60 = vunpack.i.h.bf16 %v4284_v55  ;;  %v4285_v61 = vunpack.i.l.bf16 %v4284_v55 }
 0x363   : > { %v5138_v47 = vpop.eup %4412 }
 0x364   : > { %v5140_v49 = vpop.eup %4414  ;;  %v721_v50 = vmul.f32 1.442695, %v708_v46  ;;  %v730_v52 = vsel %vm302_vm0, %v5138_v47, 0.0  ;;  %v4008_v4 = vpack.c.bf16 %v4286_v60, %v4285_v61 }
 0x365   : > { %731 = vadd.xlane.f32.xlu0 %v730_v52  ;;  %v702_v53 = vpop.xlane.xlu0 %701  ;;  %v727_v54 = vsel %vm302_vm0, %v5140_v49, 0.0 }
 0x366   : > { %4420 = vpow2.f32 %v721_v50  ;;  %728 = vadd.xlane.f32.xlu1 %v727_v54  ;;  %v710_v10 = vsub.f32 %v5125_v26, %v702_v53 }
 0x367   : > { %4422 = vpow2.f32 %v719_v9 }
 0x368   : > { %v5146_v57 = vpop.eup %4416  ;;  %v725_v11 = vmul.f32 1.442695, %v710_v10 }
 0x369   : > { %v4279_v58 = vpop.permute.xlu0 %4278  ;;  %v736_v59 = vsel %vm302_vm0, %v5146_v57, 0.0 }
 0x36a   : > { %v4281_v62 = vunpack.i.h.bf16 %v4279_v58  ;;  %v4280_v0 = vunpack.i.l.bf16 %v4279_v58  ;;  %737 = vadd.xlane.f32.xlu0 %v736_v59  ;;  %4424 = vpow2.f32 %v725_v11 }
 0x36c   : > { %v5150_v1 = vpop.eup %4418  ;;  %v4004_v2 = vpack.c.bf16 %v4281_v62, %v4280_v0 }
 0x36d   : > { %v733_v3 = vsel %vm302_vm0, %v5150_v1, 0.0 }
 0x36e   : > { %4005 = vmatprep.subr.bf16.mxu0 %v4004_v2  ;;  %734 = vadd.xlane.f32.xlu1 %v733_v3 }
 0x36f   : > { %4007 = vmatpush3.bf16.msra.mxu0 %v4004_v2 }
 0x370   : > { %v5154_v5 = vpop.eup %4420  ;;  %4009 = vmatprep.subr.bf16.mxu0 %v4008_v4 }
 0x371   : > { %v742_v6 = vsel %vm302_vm0, %v5154_v5, 0.0  ;;  %v5164_v12 = vpop.eup %4422 }
 0x372   : > { %743 = vadd.xlane.f32.xlu0 %v742_v6  ;;  %v739_v13 = vsel %vm302_vm0, %v5164_v12, 0.0 }
 0x374   : > { %v5168_v27 = vpop.eup %4424 }
 0x375   : > { %v748_v28 = vsel %vm302_vm0, %v5168_v27, 0.0 }
 0x37f   : > { %4293 = vrot.lane.b32.xlu1 %v5051_v22, %s4742_s23 }
 0x388   : > { %4288 = vrot.lane.b32.xlu0 %v5062_v25, %s4741_s26 }
 0x392   : > { %v699_v7 = vpop.xlane.xlu1 %698 }
 0x393   : > { %v709_v26 = vsub.f32 %v5134_v30, %v699_v7 }
 0x395   : > { %v723_v31 = vmul.f32 1.442695, %v709_v26 }
 0x397   : > { %4426 = vpow2.f32 %v723_v31 }
 0x3a1   : > { %v5181_v32 = vpop.eup %4426 }
 0x3a2   : > { %v745_v33 = vsel %vm302_vm0, %v5181_v32, 0.0 }
 0x3a3   : > { %740 = vadd.xlane.f32.xlu1 %v739_v13 }
 0x3a7   : > { %749 = vadd.xlane.f32.xlu0 %v748_v28 }
 0x3b4   : > { %4298 = vrot.lane.b32.xlu1 %v5062_v25, %s4742_s23 }
 0x3bd   : > { %1103 = vrot.lane.b32.xlu0 %v5047_v21, %s4743_s27 }
 0x3c1   : > { %1107 = vrot.lane.b32.xlu0 %v5058_v24, %s4743_s27 }
 0x3c5   : > { %4303 = vrot.lane.b32.xlu0 %v5033_v16, %s4742_s23 }
 0x3c9   : > { %986 = vrot.lane.b32.xlu0 %v5027_v15, %s4743_s27 }
 0x3cd   : > { %990 = vrot.lane.b32.xlu0 %v5038_v18, %s4743_s27 }
 0x3d8   : > { %746 = vadd.xlane.f32.xlu1 %v745_v33 }
 0x3e9   : > { %1105 = vrot.lane.b32.xlu1 %v5044_v20, %s4743_s27 }
 0x3ed   : > { %1109 = vrot.lane.b32.xlu1 %v5056_v23, %s4743_s27 }
 0x3f1   : > { %4308 = vrot.lane.b32.xlu1 %v5042_v19, %s4742_s23 }
 0x3f2   : > { %v732_v30 = vpop.xlane.xlu0 %731 }
 0x3f3   : > { %4428 = vrcp.f32 %v732_v30  ;;  %v729_v34 = vpop.xlane.xlu1 %728 }
 0x3f4   : > { %4430 = vrcp.f32 %v729_v34 }
 0x3f5   : > { %988 = vrot.lane.b32.xlu1 %v5025_v14, %s4743_s27 }
 0x3f7   : > { %v738_v35 = vpop.xlane.xlu0 %737 }
 0x3f8   : > { %4432 = vrcp.f32 %v738_v35 }
 0x3f9   : > { %992 = vrot.lane.b32.xlu1 %v5036_v17, %s4743_s27  ;;  %s5615_s27 = scalar_lea.hbm %s5668_s5, %s3491_s24 }
 0x3fb   : > { %v735_v36 = vpop.xlane.xlu1 %734 }
 0x3fc   : > { %4434 = vrcp.f32 %v735_v36 }
 0x3fd   : > { %v4429_v37 = vpop.eup %4428 }
 0x3fe   : > { %v4431_v38 = vpop.eup %4430  ;;  %v760_v41 = vmul.f32 %v4429_v37, %v5138_v47 }
 0x3ff   : > { %v744_v39 = vpop.xlane.xlu0 %743  ;;  %v759_v40 = vmul.f32 %v4431_v38, %v5140_v49  ;;  %v4294_v42 = vpop.permute.xlu1 %4293 }
 0x400   : > { %v4296_v44 = vunpack.i.h.bf16 %v4294_v42  ;;  %v4295_v45 = vunpack.i.l.bf16 %v4294_v42  ;;  %4436 = vrcp.f32 %v744_v39 }
 0x401   : > { %3724 = vmatprep.mubr.msk.f32.mxu0 %vm302_vm0, %v759_v40 }
 0x402   : > { %3725 = vmatmul.mubr.msk.f32.vlgmr.msra.gmra.mrb[12].mxu0 %vm302_vm0, %v760_v41  ;;  %v4433_v52 = vpop.eup %4432  ;;  %v4028_v58 = vpack.c.bf16 %v4296_v44, %v4295_v45 }
 0x403   : > { %4011 = vmatpush3.bf16.msra.mxu0 %v4008_v4  ;;  %v4289_v43 = vpop.permute.xlu0 %4288  ;;  %v762_v47 = vmul.f32 %v4433_v52, %v5146_v57 }
 0x404   : > { %v4291_v46 = vunpack.i.h.bf16 %v4289_v43  ;;  %v4290_v50 = vunpack.i.l.bf16 %v4289_v43 }
 0x406   : > { %v4435_v53 = vpop.eup %4434  ;;  %v4012_v54 = vpack.c.bf16 %v4291_v46, %v4290_v50 }
 0x407   : > { %v761_v55 = vmul.f32 %v4435_v53, %v5150_v1 }
 0x408   : > { %4013 = vmatprep.subr.bf16.mxu0 %v4012_v54 }
 0x409   : > { %3727 = vmatprep.mubr.msk.f32.mxu0 %vm302_vm0, %v761_v55  ;;  %4015 = vmatpush3.bf16.msra.mxu0 %v4012_v54 }
 0x40a   : > { %3728 = vmatmul.mubr.msk.f32.gmra.mrb[14].mxu0 %vm302_vm0, %v762_v47  ;;  %4030 = vmatprep.subr.msk.bf16.mxu0 %vm5069_vm2, %v4028_v58  ;;  %v4437_v62 = vpop.eup %4436 }
 0x40b   : > { %v764_v4 = vmul.f32 %v4437_v62, %v5154_v5 }
 0x430   : > { %v741_v49 = vpop.xlane.xlu1 %740 }
 0x431   : > { %4438 = vrcp.f32 %v741_v49 }
 0x434   : > { %v750_v59 = vpop.xlane.xlu0 %749  ;;  %v4299_v60 = vpop.permute.xlu1 %4298 }
 0x435   : > { %v4301_v1 = vunpack.i.h.bf16 %v4299_v60  ;;  %v4300_v2 = vunpack.i.l.bf16 %v4299_v60  ;;  %4440 = vrcp.f32 %v750_v59 }
 0x437   : > { %v4034_v6 = vpack.c.bf16 %v4301_v1, %v4300_v2 }
 0x438   : > { %v1104_v61 = vpop.permute.xlu0 %1103 }
 0x43b   : > { %v4439_v0 = vpop.eup %4438 }
 0x43c   : > { %v1108_v3 = vpop.permute.xlu0 %1107  ;;  %v763_v57 = vmul.f32 %v4439_v0, %v5164_v12 }
 0x43e   : > { %3738 = vmatprep.mubr.msk.f32.mxu0 %vm302_vm0, %v763_v57 }
 0x43f   : > { %3739 = vmatmul.mubr.msk.f32.vlgmr.msra.gmra.mrb[16].mxu0 %vm302_vm0, %v764_v4  ;;  %v4441_v7 = vpop.eup %4440 }
 0x440   : > { %4033 = vmatpush3.bf16.xpose.msk.msra.mxu0 %vm5069_vm2, %v4028_v58  ;;  %v4304_v8 = vpop.permute.xlu0 %4303  ;;  %v766_v35 = vmul.f32 %v4441_v7, %v5168_v27 }
 0x441   : > { %v4306_v9 = vunpack.i.h.bf16 %v4304_v8  ;;  %v4305_v10 = vunpack.i.l.bf16 %v4304_v8  ;;  %4036 = vmatprep.subr.msk.bf16.mxu0 %vm5069_vm2, %v4034_v6 }
 0x443   : > { %v4016_v11 = vpack.c.bf16 %v4306_v9, %v4305_v10 }
 0x444   : > { %v987_v13 = vpop.permute.xlu0 %986 }
 0x445   : > { %4018 = vmatprep.subr.msk.bf16.mxu1 %vm5069_vm2, %v4016_v11  ;;  %3752 = vmatprep.mubr.msk.f32.mxu1 %vm448_vm1, %v987_v13 }
 0x446   : > { %4021 = vmatpush3.bf16.xpose.msk.msra.mxu1 %vm5069_vm2, %v4016_v11 }
 0x448   : > { %4039 = vmatpush3.bf16.xpose.msk.msra.mxu0 %vm5069_vm2, %v4034_v6  ;;  %v991_v27 = vpop.permute.xlu0 %990 }
 0x465   : > { %v747_v5 = vpop.xlane.xlu1 %746 }
 0x466   : > { %4442 = vrcp.f32 %v747_v5 }
 0x469   : > { %v1106_v12 = vpop.permute.xlu1 %1105 }
 0x46d   : > { %v1110_v28 = vpop.permute.xlu1 %1109 }
 0x470   : > { %v4443_v26 = vpop.eup %4442 }
 0x471   : > { %v4309_v31 = vpop.permute.xlu1 %4308  ;;  %v765_v33 = vmul.f32 %v4443_v26, %v5181_v32 }
 0x472   : > { %v4311_v30 = vunpack.i.h.bf16 %v4309_v31  ;;  %v4310_v34 = vunpack.i.l.bf16 %v4309_v31 }
 0x473   : > { %3741 = vmatprep.mubr.msk.f32.mxu0 %vm302_vm0, %v765_v33 }
 0x474   : > { %v4022_v36 = vpack.c.bf16 %v4311_v30, %v4310_v34  ;;  %3742 = vmatmul.mubr.msk.f32.gmra.mrb[18].mxu0 %vm302_vm0, %v766_v35 }
 0x475   : > { %3766 = vmatprep.mubr.msk.f32.mxu0 %vm448_vm1, %v1104_v61  ;;  %v989_v32 = vpop.permute.xlu1 %988 }
 0x476   : > { %4024 = vmatprep.subr.msk.bf16.mxu1 %vm5069_vm2, %v4022_v36 }
 0x477   : > { %4027 = vmatpush3.bf16.xpose.msk.msra.mxu1 %vm5069_vm2, %v4022_v36 }
 0x478   : > { %3767 = vmatmul.mubr.msk.f32.vlgmr.msra.gmra.mrb[20].mxu0 %vm448_vm1, %v1106_v12 }
 0x479   : > { %3769 = vmatprep.mubr.msk.f32.mxu0 %vm448_vm1, %v1108_v3  ;;  %v993_v37 = vpop.permute.xlu1 %992 }
 0x47c   : > { %3770 = vmatmul.mubr.msk.f32.gmra.mrb[22].mxu0 %vm448_vm1, %v1110_v28 }
 0x47e   : > { %3753 = vmatmul.mubr.msk.f32.vlgmr.msra.gmra.mrb[4].mxu1 %vm448_vm1, %v989_v32 }
 0x47f   : > { %3755 = vmatprep.mubr.msk.f32.mxu1 %vm448_vm1, %v991_v27 }
 0x482   : > { %3756 = vmatmul.mubr.msk.f32.gmra.mrb[6].mxu1 %vm448_vm1, %v993_v37 }
 0x4d5   : > { %v5231_v38 = vpop.f32.mrb[12].mxu0 }
 0x4d6   : > { %v5233_v39 = vpop.f32.mrb[13].mxu0 }
 0x4dd   : > { %v5235_v40 = vpop.f32.mrb[14].mxu0 }
 0x4de   : > { %v5237_v41 = vpop.f32.mrb[15].mxu0 }
 0x512   : > { %v5239_v42 = vpop.f32.mrb[16].mxu0 }
 0x513   : > { %v5241_v43 = vpop.f32.mrb[17].mxu0 }
 0x547   : > { %v5243_v44 = vpop.f32.mrb[18].mxu0 }
 0x548   : > { %v5245_v45 = vpop.f32.mrb[19].mxu0 }
 0x54b   : > { %v3768_v46 = vpop.f32.mrb[20].mxu0 }
 0x54c   : > { %v1225_v50 = vmul.f32 0.35355338, %v3768_v46  ;;  %v1201_v52 = vpop.f32.mrb[21].mxu0 }
 0x54d   : > { %v1224_v53 = vmul.f32 0.35355338, %v1201_v52 }
 0x54e   : > { %v1233_v54 = vadd.f32 %v1225_v50, %v5101_v48 }
 0x54f   : > { %v3771_v55 = vpop.f32.mrb[22].mxu0  ;;  %v1232_v58 = vadd.f32 %v1224_v53, %v5103_v51 }
 0x550   : > { %v1211_v47 = vpop.f32.mrb[23].mxu0  ;;  %v1251_v49 = vsel %vm302_vm0, %v1233_v54, -inf  ;;  %v1227_v59 = vmul.f32 0.35355338, %v3771_v55 }
 0x551   : > { %v1226_v60 = vmul.f32 0.35355338, %v1211_v47  ;;  %v5250_v61 = vpop.f32.mrb[4].mxu1  ;;  %1252 = vmax.xlane.f32.xlu1 %v1251_v49  ;;  %v1248_v62 = vsel %vm302_vm0, %v1232_v58, -inf }
 0x552   : > { %v5253_v0 = vpop.f32.mrb[5].mxu1  ;;  %1249 = vmax.xlane.f32.xlu0 %v1248_v62  ;;  %v1235_v57 = vadd.f32 %v1227_v59, %v5107_v56 }
 0x553   : > { %v1234_v1 = vadd.f32 %v1226_v60, %v5112_v63  ;;  %v1220_v59 = vmul.f32 0.35355338, %v5253_v0 }
 0x554   : > { %v1257_v6 = vsel %vm302_vm0, %v1235_v57, -inf }
 0x555   : > { %v5256_v2 = vpop.f32.mrb[6].mxu1  ;;  %v1254_v3 = vsel %vm302_vm0, %v1234_v1, -inf  ;;  %v5299_v62 = vadd.f32 %v1220_v59, %v5103_v51 }
 0x556   : > { %v1094_v4 = vpop.f32.mrb[7].mxu1  ;;  %1255 = vmax.xlane.f32.xlu0 %v1254_v3 }
 0x557   : > { %v1222_v60 = vmul.f32 0.35355338, %v1094_v4  ;;  %v1236_v3 = vsel %vm302_vm0, %v5299_v62, -inf }
 0x55a   : > { %1258 = vmax.xlane.f32.xlu0 %v1257_v6  ;;  %v1221_v6 = vmul.f32 0.35355338, %v5250_v61 }
 0x55c   : > { %v5314_v4 = vadd.f32 %v1221_v6, %v5101_v48 }
 0x562   : > { %4318 = vrot.lane.b32.xlu1 %v5062_v25, %s4744_s13 }
 0x566   : > { %4328 = vrot.lane.b32.xlu1 %v5042_v19, %s4745_s16 }
 0x570   : > { %4313 = vrot.lane.b32.xlu0 %v5051_v22, %s4744_s13 }
 0x5de   : > { %v1253_v8 = vpop.xlane.xlu1 %1252 }
 0x5df   : > { %v1265_v9 = vsub.f32 %v1233_v54, %v1253_v8  ;;  %v1250_v10 = vpop.xlane.xlu0 %1249 }
 0x5e0   : > { %v1264_v11 = vsub.f32 %v1232_v58, %v1250_v10 }
 0x5e1   : > { %v1278_v13 = vmul.f32 1.442695, %v1265_v9  ;;  %v1239_v9 = vsel %vm302_vm0, %v5314_v4, -inf }
 0x5e2   : > { %v1276_v5 = vmul.f32 1.442695, %v1264_v11  ;;  %v4319_v26 = vpop.permute.xlu1 %4318 }
 0x5e3   : > { %4444 = vpow2.f32 %v1278_v13  ;;  %v1256_v12 = vpop.xlane.xlu0 %1255  ;;  %v4321_v34 = vunpack.i.h.bf16 %v4319_v26  ;;  %v4320_v36 = vunpack.i.l.bf16 %v4319_v26 }
 0x5e4   : > { %4446 = vpow2.f32 %v1276_v5  ;;  %v1266_v28 = vsub.f32 %v1234_v1, %v1256_v12  ;;  %v1223_v1 = vmul.f32 0.35355338, %v5256_v2 }
 0x5e5   : > { %v4052_v54 = vpack.c.bf16 %v4321_v34, %v4320_v36 }
 0x5e6   : > { %v1280_v33 = vmul.f32 1.442695, %v1266_v28  ;;  %v5311_v0 = vadd.f32 %v1223_v1, %v5107_v56  ;;  %v4329_v61 = vpop.permute.xlu1 %4328 }
 0x5e7   : > { %v1259_v7 = vpop.xlane.xlu0 %1258 }
 0x5e8   : > { %v1267_v31 = vsub.f32 %v1235_v57, %v1259_v7  ;;  %v5305_v57 = vadd.f32 %v1222_v60, %v5112_v63  ;;  %v1245_v2 = vsel %vm302_vm0, %v5311_v0, -inf }
 0x5ea   : > { %v1282_v30 = vmul.f32 1.442695, %v1267_v31  ;;  %v1242_v8 = vsel %vm302_vm0, %v5305_v57, -inf }
 0x5eb   : > { %v4314_v35 = vpop.permute.xlu0 %4313 }
 0x5ec   : > { %4448 = vpow2.f32 %v1282_v30  ;;  %v4316_v32 = vunpack.i.h.bf16 %v4314_v35  ;;  %v4315_v27 = vunpack.i.l.bf16 %v4314_v35  ;;  %v4330_v30 = vunpack.i.l.bf16 %v4329_v61 }
 0x5ed   : > { %v5267_v37 = vpop.eup %4444  ;;  %4450 = vpow2.f32 %v1280_v33  ;;  %v4331_v33 = vunpack.i.h.bf16 %v4329_v61 }
 0x5ee   : > { %v5269_v46 = vpop.eup %4446  ;;  %v4048_v50 = vpack.c.bf16 %v4316_v32, %v4315_v27  ;;  %v1299_v52 = vsel %vm302_vm0, %v5267_v37, 0.0 }
 0x5ef   : > { %1300 = vadd.xlane.f32.xlu0 %v1299_v52  ;;  %v1296_v53 = vsel %vm302_vm0, %v5269_v46, 0.0  ;;  %v4062_v32 = vpack.c.bf16 %v4331_v33, %v4330_v30 }
 0x5f0   : > { %1297 = vadd.xlane.f32.xlu1 %v1296_v53  ;;  %4049 = vmatprep.subr.bf16.mxu0 %v4048_v50 }
 0x5f1   : > { %4051 = vmatpush3.bf16.msra.mxu0 %v4048_v50 }
 0x5f2   : > { %4053 = vmatprep.subr.bf16.mxu0 %v4052_v54 }
 0x5f5   : > { %4055 = vmatpush3.bf16.msra.mxu0 %v4052_v54 }
 0x5f6   : > { %v5275_v55 = vpop.eup %4448 }
 0x5f7   : > { %v1305_v58 = vsel %vm302_vm0, %v5275_v55, 0.0  ;;  %v5279_v47 = vpop.eup %4450 }
 0x5f8   : > { %1306 = vadd.xlane.f32.xlu1 %v1305_v58  ;;  %v1302_v49 = vsel %vm302_vm0, %v5279_v47, 0.0 }
 0x5fc   : > { %1303 = vadd.xlane.f32.xlu1 %v1302_v49 }
 0x605   : > { %4323 = vrot.lane.b32.xlu0 %v5033_v16, %s4745_s16 }
 0x609   : > { %4333 = vrot.lane.b32.xlu0 %v5051_v22, %s4745_s16 }
 0x60d   : > { %1803 = vrot.lane.b32.xlu0 %v5025_v14, %s4746_s28  ;;  %1801 = vrot.lane.b32.xlu1 %v5027_v15, %s4746_s28 }
 0x611   : > { %1805 = vrot.lane.b32.xlu0 %v5038_v18, %s4746_s28  ;;  %4338 = vrot.lane.b32.xlu1 %v5062_v25, %s4745_s16  ;;  %s4751_s16 = smov [#allocation10]  }
 0x615   : > { %1918 = vrot.lane.b32.xlu0 %v5047_v21, %s4746_s28  ;;  %1807 = vrot.lane.b32.xlu1 %v5036_v17, %s4746_s28 }
 0x619   : > { %1922 = vrot.lane.b32.xlu0 %v5058_v24, %s4746_s28  ;;  %1920 = vrot.lane.b32.xlu1 %v5044_v20, %s4746_s28 }
 0x61d   : > { %1924 = vrot.lane.b32.xlu1 %v5056_v23, %s4746_s28  ;;  %s4662_s28 = sshll.u32 %s4751_s16, 4  ;;  %s4663_s28 = int_to_ptr.vmem [resolvable:$false] %s4662_s28 }
 0x61e   : > { %p4665_p12 = scmp.lt.s32.totalorder %s5617_s8, %s4663_s28 }
 0x638   : > { %1237 = vmax.xlane.f32.xlu0 %v1236_v3 }
 0x63c   : > { %1243 = vmax.xlane.f32.xlu0 %v1242_v8 }
 0x640   : > { %1246 = vmax.xlane.f32.xlu0 %v1245_v2 }
 0x641   : > { %1240 = vmax.xlane.f32.xlu1 %v1239_v9 }
 0x67c   : > { %v1301_v10 = vpop.xlane.xlu0 %1300 }
 0x67d   : > { %4452 = vrcp.f32 %v1301_v10  ;;  %v1298_v11 = vpop.xlane.xlu1 %1297 }
 0x67e   : > { %4454 = vrcp.f32 %v1298_v11 }
 0x680   : > { %v4324_v13 = vpop.permute.xlu0 %4323 }
 0x681   : > { %v4326_v5 = vunpack.i.h.bf16 %v4324_v13  ;;  %v4325_v12 = vunpack.i.l.bf16 %v4324_v13 }
 0x683   : > { %v4056_v28 = vpack.c.bf16 %v4326_v5, %v4325_v12 }
 0x684   : > { %v4334_v27 = vpop.permute.xlu0 %4333 }
 0x685   : > { %v1307_v7 = vpop.xlane.xlu1 %1306  ;;  %4058 = vmatprep.subr.msk.bf16.mxu0 %vm5069_vm2, %v4056_v28  ;;  %v4336_v52 = vunpack.i.h.bf16 %v4334_v27  ;;  %v4335_v53 = vunpack.i.l.bf16 %v4334_v27 }
 0x686   : > { %4456 = vrcp.f32 %v1307_v7 }
 0x687   : > { %v4453_v26 = vpop.eup %4452  ;;  %v4068_v58 = vpack.c.bf16 %v4336_v52, %v4335_v53 }
 0x688   : > { %v4455_v31 = vpop.eup %4454  ;;  %v1321_v36 = vmul.f32 %v4453_v26, %v5267_v37  ;;  %v1804_v37 = vpop.permute.xlu0 %1803 }
 0x689   : > { %v1304_v34 = vpop.xlane.xlu1 %1303  ;;  %v1320_v35 = vmul.f32 %v4455_v31, %v5269_v46 }
 0x68a   : > { %4458 = vrcp.f32 %v1304_v34 }
 0x68b   : > { %3794 = vmatprep.mubr.msk.f32.mxu0 %vm302_vm0, %v1320_v35 }
 0x68c   : > { %3795 = vmatmul.mubr.msk.f32.vlgmr.msra.gmra.mrb[24].mxu0 %vm302_vm0, %v1321_v36  ;;  %v1806_v6 = vpop.permute.xlu0 %1805 }
 0x68d   : > { %4061 = vmatpush3.bf16.xpose.msk.msra.mxu0 %vm5069_vm2, %v4056_v28  ;;  %v1802_v50 = vpop.permute.xlu1 %1801 }
 0x68e   : > { %4064 = vmatprep.subr.msk.bf16.mxu0 %vm5069_vm2, %v4062_v32 }
 0x690   : > { %v4457_v54 = vpop.eup %4456 }
 0x691   : > { %v4339_v49 = vpop.permute.xlu1 %4338  ;;  %v1323_v60 = vmul.f32 %v4457_v54, %v5275_v55 }
 0x692   : > { %v4341_v1 = vunpack.i.h.bf16 %v4339_v49  ;;  %v4340_v3 = vunpack.i.l.bf16 %v4339_v49 }
 0x694   : > { %v4459_v46 = vpop.eup %4458  ;;  %v4074_v8 = vpack.c.bf16 %v4341_v1, %v4340_v3 }
 0x695   : > { %4067 = vmatpush3.bf16.xpose.msk.msra.mxu0 %vm5069_vm2, %v4062_v32  ;;  %v1322_v59 = vmul.f32 %v4459_v46, %v5279_v47  ;;  %v1808_v55 = vpop.permute.xlu1 %1807  ;;  %v1919_v47 = vpop.permute.xlu0 %1918 }
 0x696   : > { %4070 = vmatprep.subr.msk.bf16.mxu0 %vm5069_vm2, %v4068_v58 }
 0x697   : > { %3797 = vmatprep.mubr.msk.f32.mxu0 %vm302_vm0, %v1322_v59 }
 0x698   : > { %3798 = vmatmul.mubr.msk.f32.gmra.mrb[26].mxu0 %vm302_vm0, %v1323_v60 }
 0x699   : > { %3836 = vmatprep.mubr.msk.f32.mxu0 %vm448_vm1, %v1802_v50  ;;  %v1921_v2 = vpop.permute.xlu1 %1920  ;;  %v1923_v9 = vpop.permute.xlu0 %1922 }
 0x69c   : > { %3837 = vmatmul.mubr.msk.f32.vlgmr.msra.gmra.mrb[28].mxu0 %vm448_vm1, %v1804_v37 }
 0x69d   : > { %4073 = vmatpush3.bf16.xpose.msk.msra.mxu0 %vm5069_vm2, %v4068_v58  ;;  %3839 = vmatprep.mubr.msk.f32.mxu0 %vm448_vm1, %v1806_v6  ;;  %v1925_v61 = vpop.permute.xlu1 %1924 }
 0x69e   : > { %4076 = vmatprep.subr.msk.bf16.mxu0 %vm5069_vm2, %v4074_v8 }
 0x6a0   : > { %3840 = vmatmul.mubr.msk.f32.gmra.mrb[30].mxu0 %vm448_vm1, %v1808_v55 }
 0x6a1   : > { %3850 = vmatprep.mubr.msk.f32.mxu0 %vm448_vm1, %v1919_v47 }
 0x6a5   : > { %4079 = vmatpush3.bf16.xpose.msk.msra.mxu0 %vm5069_vm2, %v4074_v8 }
 0x6ac   : > { %3851 = vmatmul.mubr.msk.f32.vlgmr.msra.gmra.mrb[32].mxu0 %vm448_vm1, %v1921_v2 }
 0x6ad   : > { %3853 = vmatprep.mubr.msk.f32.mxu0 %vm448_vm1, %v1923_v9 }
 0x6b0   : > { %3854 = vmatmul.mubr.msk.f32.gmra.mrb[34].mxu0 %vm448_vm1, %v1925_v61 }
 0x6c5   : > { %v1238_v10 = vpop.xlane.xlu0 %1237 }
 0x6c6   : > { %v1260_v11 = vsub.f32 %v5299_v62, %v1238_v10 }
 0x6c8   : > { %v1268_v13 = vmul.f32 1.442695, %v1260_v11 }
 0x6c9   : > { %v1244_v5 = vpop.xlane.xlu0 %1243 }
 0x6ca   : > { %4460 = vpow2.f32 %v1268_v13  ;;  %v1262_v12 = vsub.f32 %v5305_v57, %v1244_v5 }
 0x6cc   : > { %v1272_v28 = vmul.f32 1.442695, %v1262_v12 }
 0x6cd   : > { %v1247_v7 = vpop.xlane.xlu0 %1246 }
 0x6ce   : > { %4462 = vpow2.f32 %v1272_v28  ;;  %v1263_v26 = vsub.f32 %v5311_v0, %v1247_v7  ;;  %v1241_v31 = vpop.xlane.xlu1 %1240 }
 0x6cf   : > { %v1261_v33 = vsub.f32 %v5314_v4, %v1241_v31 }
 0x6d0   : > { %v1274_v30 = vmul.f32 1.442695, %v1263_v26 }
 0x6d1   : > { %v1270_v34 = vmul.f32 1.442695, %v1261_v33 }
 0x6d3   : > { %4464 = vpow2.f32 %v1270_v34 }
 0x6d4   : > { %v4461_v35 = vpop.eup %4460  ;;  %4466 = vpow2.f32 %v1274_v30 }
 0x6d5   : > { %v1284_v62 = vsel %vm302_vm0, %v4461_v35, 0.0 }
 0x6d6   : > { %1285 = vadd.xlane.f32.xlu1 %v1284_v62 }
 0x6d8   : > { %v4463_v36 = vpop.eup %4462 }
 0x6d9   : > { %v1290_v32 = vsel %vm302_vm0, %v4463_v36, 0.0 }
 0x6da   : > { %1291 = vadd.xlane.f32.xlu1 %v1290_v32 }
 0x6dd   : > { %v4465_v57 = vpop.eup %4464 }
 0x6de   : > { %v1287_v27 = vsel %vm302_vm0, %v4465_v57, 0.0  ;;  %v4467_v50 = vpop.eup %4466 }
 0x6df   : > { %1288 = vadd.xlane.f32.xlu0 %v1287_v27  ;;  %v1293_v0 = vsel %vm302_vm0, %v4467_v50, 0.0 }
 0x6e3   : > { %1294 = vadd.xlane.f32.xlu0 %v1293_v0 }
 0x6eb   : > { %4343 = vrot.lane.b32.xlu1 %v5033_v16, %s4744_s13 }
 0x6f9   : > { %4348 = vrot.lane.b32.xlu0 %v5042_v19, %s4744_s13  ;;  %s4658_s13 = scalar_lea.vmem %s5617_s8, 1024 }
 0x6fa   : > { %p4659_p10 = scmp.ne.s32.totalorder %s5617_s8, %s4658_s13 }
 0x6fc   : > { %p4660_p3 = pnand %p4659_p10, %p4938_p5 }
 0x6fe   : > { %p4661_p7 = pneg %p4660_p3 }
 0x75f   : > { %v5364_v4 = vpop.f32.mrb[24].mxu0 }
 0x760   : > { %v5366_v52 = vpop.f32.mrb[25].mxu0 }
 0x763   : > { %v1286_v53 = vpop.xlane.xlu1 %1285 }
 0x764   : > { %4468 = vrcp.f32 %v1286_v53 }
 0x767   : > { %v1292_v54 = vpop.xlane.xlu1 %1291 }
 0x76b   : > { %v4344_v46 = vpop.permute.xlu1 %4343  ;;  %v5368_v58 = vpop.f32.mrb[26].mxu0 }
 0x76c   : > { %v4346_v37 = vunpack.i.h.bf16 %v4344_v46  ;;  %v4345_v49 = vunpack.i.l.bf16 %v4344_v46  ;;  %v1289_v59 = vpop.xlane.xlu0 %1288  ;;  %v5370_v60 = vpop.f32.mrb[27].mxu0 }
 0x76d   : > { %4470 = vrcp.f32 %v1289_v59 }
 0x76e   : > { %v4469_v1 = vpop.eup %4468  ;;  %v4040_v3 = vpack.c.bf16 %v4346_v37, %v4345_v49  ;;  %4472 = vrcp.f32 %v1292_v54 }
 0x76f   : > { %v3838_v6 = vpop.f32.mrb[28].mxu0  ;;  %v1316_v8 = vmul.f32 %v4469_v1, %v4461_v35 }
 0x770   : > { %v2036_v55 = vmul.f32 0.35355338, %v3838_v6  ;;  %4041 = vmatprep.subr.bf16.mxu1 %v4040_v3  ;;  %v1295_v47 = vpop.xlane.xlu0 %1294  ;;  %v1899_v2 = vpop.f32.mrb[29].mxu0 }
 0x771   : > { %v2035_v9 = vmul.f32 0.35355338, %v1899_v2  ;;  %4043 = vmatpush3.bf16.msra.mxu1 %v4040_v3  ;;  %3780 = vmatprep.mubr.msk.f32.mxu1 %vm302_vm0, %v1316_v8  ;;  %4474 = vrcp.f32 %v1295_v47 }
 0x772   : > { %v2044_v61 = vadd.f32 %v2036_v55, %v5101_v48 }
 0x773   : > { %v3841_v10 = vpop.f32.mrb[30].mxu0  ;;  %v2043_v11 = vadd.f32 %v2035_v9, %v5103_v51 }
 0x774   : > { %v2038_v13 = vmul.f32 0.35355338, %v3841_v10  ;;  %v4349_v5 = vpop.permute.xlu0 %4348  ;;  %v1909_v12 = vpop.f32.mrb[31].mxu0  ;;  %v2054_v28 = vsel %vm302_vm0, %v2044_v61, -inf }
 0x775   : > { %v4351_v7 = vunpack.i.h.bf16 %v4349_v5  ;;  %v4350_v26 = vunpack.i.l.bf16 %v4349_v5  ;;  %v2037_v31 = vmul.f32 0.35355338, %v1909_v12  ;;  %2055 = vmax.xlane.f32.xlu0 %v2054_v28  ;;  %v2051_v33 = vsel %vm302_vm0, %v2043_v11, -inf  ;;  %v5397_v5 = vld [vmem:[#allocation7] sm:$0xff] }
 0x776   : > { %2052 = vmax.xlane.f32.xlu1 %v2051_v33  ;;  %v2046_v30 = vadd.f32 %v2038_v13, %v5107_v56 }
 0x777   : > { %v4044_v34 = vpack.c.bf16 %v4351_v7, %v4350_v26  ;;  %v2045_v35 = vadd.f32 %v2037_v31, %v5112_v63  ;;  %v4471_v62 = vpop.eup %4470 }
 0x778   : > { %v2060_v32 = vsel %vm302_vm0, %v2046_v30, -inf  ;;  %v4473_v27 = vpop.eup %4472  ;;  %v1317_v53 = vmul.f32 %v4471_v62, %v4465_v57 }
 0x779   : > { %4045 = vmatprep.subr.bf16.mxu1 %v4044_v34  ;;  %2061 = vmax.xlane.f32.xlu0 %v2060_v32  ;;  %v2057_v0 = vsel %vm302_vm0, %v2045_v35, -inf  ;;  %v1318_v46 = vmul.f32 %v4473_v27, %v4463_v36 }
 0x77a   : > { %4047 = vmatpush3.bf16.msra.mxu1 %v4044_v34  ;;  %2058 = vmax.xlane.f32.xlu1 %v2057_v0 }
 0x77b   : > { %v4475_v54 = vpop.eup %4474 }
 0x77c   : > { %v1319_v49 = vmul.f32 %v4475_v54, %v4467_v50 }
 0x77d   : > { %3781 = vmatmul.mubr.msk.f32.vlgmr.msra.gmra.mrb[8].mxu1 %vm302_vm0, %v1317_v53 }
 0x77e   : > { %3783 = vmatprep.mubr.msk.f32.mxu1 %vm302_vm0, %v1318_v46 }
 0x77f   : > { %v3852_v37 = vpop.f32.mrb[32].mxu0 }
 0x780   : > { %v2040_v59 = vmul.f32 0.35355338, %v3852_v37  ;;  %v2016_v1 = vpop.f32.mrb[33].mxu0 }
 0x781   : > { %v2039_v3 = vmul.f32 0.35355338, %v2016_v1  ;;  %3784 = vmatmul.mubr.msk.f32.gmra.mrb[10].mxu1 %vm302_vm0, %v1319_v49 }
 0x782   : > { %v2048_v6 = vadd.f32 %v2040_v59, %v5101_v48 }
 0x783   : > { %v3855_v8 = vpop.f32.mrb[34].mxu0  ;;  %v2047_v55 = vadd.f32 %v2039_v3, %v5103_v51  ;;  %v1542_v51 = vld [vmem:[#allocation7 + $0x8] sm:$0xff] }
 0x784   : > { %v2042_v47 = vmul.f32 0.35355338, %v3855_v8  ;;  %v2026_v57 = vpop.f32.mrb[35].mxu0  ;;  %v2066_v36 = vsel %vm302_vm0, %v2048_v6, -inf  ;;  %3800 = vmatprep.subr.mxu1 %v1542_v51 }
 0x785   : > { %v2041_v2 = vmul.f32 0.35355338, %v2026_v57  ;;  %2067 = vmax.xlane.f32.xlu0 %v2066_v36  ;;  %v2063_v9 = vsel %vm302_vm0, %v2047_v55, -inf  ;;  %3801 = vmatpush3.msra.mxu1 %v1542_v51 }
 0x786   : > { %2064 = vmax.xlane.f32.xlu1 %v2063_v9  ;;  %v2050_v50 = vadd.f32 %v2042_v47, %v5107_v56  ;;  %3814 = vmatprep.subr.mxu1 %v5397_v5 }
 0x787   : > { %v5390_v10 = vadd.f32 %v2041_v2, %v5112_v63 }
 0x788   : > { %v2072_v13 = vsel %vm302_vm0, %v2050_v50, -inf }
 0x789   : > { %2073 = vmax.xlane.f32.xlu0 %v2072_v13  ;;  %v2069_v48 = vsel %vm302_vm0, %v5390_v10, -inf }
 0x78a   : > { %2070 = vmax.xlane.f32.xlu1 %v2069_v48 }
 0x79b   : > { %4353 = vrot.lane.b32.xlu1 %v5033_v16, %s4747_s12 }
 0x802   : > { %v2056_v56 = vpop.xlane.xlu0 %2055 }
 0x803   : > { %v2076_v63 = vsub.f32 %v2044_v61, %v2056_v56  ;;  %v2053_v12 = vpop.xlane.xlu1 %2052 }
 0x804   : > { %v2075_v28 = vsub.f32 %v2043_v11, %v2053_v12 }
 0x805   : > { %v2085_v7 = vmul.f32 1.442695, %v2076_v63 }
 0x806   : > { %v2083_v26 = vmul.f32 1.442695, %v2075_v28  ;;  %v2062_v31 = vpop.xlane.xlu0 %2061 }
 0x807   : > { %4476 = vpow2.f32 %v2085_v7  ;;  %v2078_v33 = vsub.f32 %v2046_v30, %v2062_v31  ;;  %v2059_v34 = vpop.xlane.xlu1 %2058 }
 0x808   : > { %4478 = vpow2.f32 %v2083_v26  ;;  %v2077_v62 = vsub.f32 %v2045_v35, %v2059_v34 }
 0x809   : > { %v2089_v32 = vmul.f32 1.442695, %v2078_v33 }
 0x80a   : > { %v2087_v27 = vmul.f32 1.442695, %v2077_v62  ;;  %v2357_v62 = vld [vmem:[#allocation7 + $0x10] sm:$0xff] }
 0x80b   : > { %4480 = vpow2.f32 %v2089_v32 }
 0x80c   : > { %4482 = vpow2.f32 %v2087_v27 }
 0x811   : > { %v5400_v0 = vpop.eup %4476 }
 0x812   : > { %v5402_v53 = vpop.eup %4478  ;;  %v2068_v54 = vpop.xlane.xlu0 %2067  ;;  %v2102_v61 = vsel %vm302_vm0, %v5400_v0, 0.0 }
 0x813   : > { %v2080_v11 = vsub.f32 %v2048_v6, %v2068_v54  ;;  %v2065_v46 = vpop.xlane.xlu1 %2064  ;;  %2103 = vadd.xlane.f32.xlu0 %v2102_v61  ;;  %v2099_v30 = vsel %vm302_vm0, %v5402_v53, 0.0 }
 0x814   : > { %v2079_v37 = vsub.f32 %v2047_v55, %v2065_v46  ;;  %2100 = vadd.xlane.f32.xlu1 %v2099_v30 }
 0x815   : > { %v5408_v35 = vpop.eup %4480  ;;  %v2093_v49 = vmul.f32 1.442695, %v2080_v11 }
 0x816   : > { %v5410_v59 = vpop.eup %4482  ;;  %v2091_v1 = vmul.f32 1.442695, %v2079_v37  ;;  %v2074_v3 = vpop.xlane.xlu0 %2073  ;;  %v2108_v8 = vsel %vm302_vm0, %v5408_v35, 0.0 }
 0x817   : > { %4484 = vpow2.f32 %v2093_v49  ;;  %v2082_v47 = vsub.f32 %v2050_v50, %v2074_v3  ;;  %2109 = vadd.xlane.f32.xlu0 %v2108_v8  ;;  %v2105_v6 = vsel %vm302_vm0, %v5410_v59, 0.0  ;;  %v2071_v48 = vpop.xlane.xlu1 %2070 }
 0x818   : > { %4486 = vpow2.f32 %v2091_v1  ;;  %2106 = vadd.xlane.f32.xlu1 %v2105_v6  ;;  %v2081_v51 = vsub.f32 %v5390_v10, %v2071_v48 }
 0x819   : > { %v2097_v55 = vmul.f32 1.442695, %v2082_v47 }
 0x81a   : > { %v2095_v56 = vmul.f32 1.442695, %v2081_v51 }
 0x81b   : > { %4488 = vpow2.f32 %v2097_v55  ;;  %v4354_v63 = vpop.permute.xlu1 %4353 }
 0x81c   : > { %4490 = vpow2.f32 %v2095_v56  ;;  %v4356_v12 = vunpack.i.h.bf16 %v4354_v63  ;;  %v4355_v28 = vunpack.i.l.bf16 %v4354_v63 }
 0x81e   : > { %v4080_v26 = vpack.c.bf16 %v4356_v12, %v4355_v28 }
 0x821   : > { %v5416_v57 = vpop.eup %4484 }
 0x822   : > { %v5418_v36 = vpop.eup %4486  ;;  %v2114_v2 = vsel %vm302_vm0, %v5416_v57, 0.0 }
 0x823   : > { %2115 = vadd.xlane.f32.xlu0 %v2114_v2  ;;  %v2111_v9 = vsel %vm302_vm0, %v5418_v36, 0.0 }
 0x824   : > { %2112 = vadd.xlane.f32.xlu1 %v2111_v9 }
 0x825   : > { %v5424_v50 = vpop.eup %4488 }
 0x826   : > { %v2120_v13 = vsel %vm302_vm0, %v5424_v50, 0.0  ;;  %v5446_v31 = vpop.eup %4490 }
 0x827   : > { %2121 = vadd.xlane.f32.xlu0 %v2120_v13 }
 0x835   : > { %4363 = vrot.lane.b32.xlu1 %v5051_v22, %s4747_s12 }
 0x83d   : > { %4358 = vrot.lane.b32.xlu0 %v5042_v19, %s4747_s12 }
 0x841   : > { %4373 = vrot.lane.b32.xlu0 %v5033_v16, %s4748_s9 }
 0x845   : > { %4383 = vrot.lane.b32.xlu0 %v5051_v22, %s4748_s9 }
 0x849   : > { %2495 = vrot.lane.b32.xlu0 %v5027_v15, %s4749_s15 }
 0x84d   : > { %2499 = vrot.lane.b32.xlu0 %v5038_v18, %s4749_s15 }
 0x850   : > { %v3782_v7 = vpop.f32.mrb[8].mxu1 }
 0x851   : > { %2612 = vrot.lane.b32.xlu0 %v5047_v21, %s4749_s15  ;;  %v1414_v10 = vpop.f32.mrb[9].mxu1  ;;  %v2117_v21 = vsel %vm302_vm0, %v5446_v31, 0.0 }
 0x852   : > { %3802 = vmatprep.mubr.msk.f32.mxu1 %vm448_vm1, %v1414_v10 }
 0x853   : > { %3803 = vmatmul.mubr.msk.f32.vlgmr.msra.gmra.mrb[12].mxu1 %vm448_vm1, %v3782_v7 }
 0x854   : > { %3815 = vmatpush3.msra.mxu1 %v5397_v5  ;;  %v3785_v15 = vpop.f32.mrb[10].mxu1 }
 0x855   : > { %2616 = vrot.lane.b32.xlu0 %v5058_v24, %s4749_s15  ;;  %4081 = vmatprep.subr.bf16.mxu1 %v4080_v26  ;;  %v1424_v18 = vpop.f32.mrb[11].mxu1 }
 0x856   : > { %3805 = vmatprep.mubr.msk.f32.mxu1 %vm448_vm1, %v1424_v18 }
 0x857   : > { %3806 = vmatmul.mubr.msk.f32.gmra.mrb[14].mxu1 %vm448_vm1, %v3785_v15 }
 0x858   : > { %3808 = vmatprep.mubr.msk.f32.mxu1 %vm448_vm1, %v5366_v52 }
 0x859   : > { %2118 = vadd.xlane.f32.xlu1 %v2117_v21 }
 0x85b   : > { %3809 = vmatmul.mubr.msk.f32.gmra.mrb[16].mxu1 %vm448_vm1, %v5364_v4 }
 0x85c   : > { %3811 = vmatprep.mubr.msk.f32.mxu1 %vm448_vm1, %v5370_v60 }
 0x85f   : > { %3812 = vmatmul.mubr.msk.f32.gmra.mrb[18].mxu1 %vm448_vm1, %v5368_v58 }
 0x860   : > { %3816 = vmatprep.mubr.msk.f32.mxu1 %vm448_vm1, %v5233_v39 }
 0x863   : > { %3817 = vmatmul.mubr.msk.f32.vlgmr.msra.gmra.mrb[12].mxu1 %vm448_vm1, %v5231_v38 }
 0x864   : > { %4083 = vmatpush3.bf16.msra.mxu1 %v4080_v26  ;;  %3819 = vmatprep.mubr.msk.f32.mxu1 %vm448_vm1, %v5237_v41 }
 0x867   : > { %3820 = vmatmul.mubr.msk.f32.gmra.mrb[14].mxu1 %vm448_vm1, %v5235_v40 }
 0x868   : > { %3822 = vmatprep.mubr.msk.f32.mxu1 %vm448_vm1, %v5241_v43 }
 0x86a   : > { %4368 = vrot.lane.b32.xlu1 %v5062_v25, %s4747_s12  ;;  %s4664_s12 = scalar_lea.vmem %s4663_s28, 2048 }
 0x86b   : > { %3823 = vmatmul.mubr.msk.f32.gmra.mrb[16].mxu1 %vm448_vm1, %v5239_v42  ;;  %p4666_p1 = scmp.lt.s32.totalorder %s4664_s12, %s4658_s13 }
 0x86c   : > { %3825 = vmatprep.mubr.msk.f32.mxu1 %vm448_vm1, %v5245_v45 }
 0x86d   : > { %p4667_p2 = por %p4666_p1, %p4665_p12 }
 0x86e   : > { %4378 = vrot.lane.b32.xlu1 %v5042_v19, %s4748_s9 }
 0x86f   : > { %3826 = vmatmul.mubr.msk.f32.gmra.mrb[18].mxu1 %vm448_vm1, %v5243_v44  ;;  %p4668_p4 = pnand %p4667_p2, %p4661_p7 }
 0x872   : > { %4388 = vrot.lane.b32.xlu1 %v5062_v25, %s4748_s9 }
 0x876   : > { %2497 = vrot.lane.b32.xlu1 %v5025_v14, %s4749_s15 }
 0x87a   : > { %2501 = vrot.lane.b32.xlu1 %v5036_v17, %s4749_s15 }
 0x87e   : > { %2614 = vrot.lane.b32.xlu1 %v5044_v20, %s4749_s15 }
 0x882   : > { %2618 = vrot.lane.b32.xlu1 %v5056_v23, %s4749_s15 }
 0x8a0   : > { %v2104_v38 = vpop.xlane.xlu0 %2103 }
 0x8a1   : > { %v2101_v24 = vpop.xlane.xlu1 %2100 }
 0x8a2   : > { %4492 = vrcp.f32 %v2101_v24 }
 0x8a3   : > { %4494 = vrcp.f32 %v2104_v38 }
 0x8a4   : > { %v2110_v40 = vpop.xlane.xlu0 %2109 }
 0x8a5   : > { %v2107_v41 = vpop.xlane.xlu1 %2106 }
 0x8ac   : > { %v4493_v39 = vpop.eup %4492 }
 0x8ad   : > { %v2131_v42 = vmul.f32 %v4493_v39, %v5402_v53  ;;  %v4495_v60 = vpop.eup %4494 }
 0x8ae   : > { %v2132_v53 = vmul.f32 %v4495_v60, %v5400_v0 }
 0x8af   : > { %3864 = vmatprep.mubr.msk.f32.mxu1 %vm302_vm0, %v2131_v42 }
 0x8b0   : > { %v2116_v14 = vpop.xlane.xlu0 %2115 }
 0x8b1   : > { %v2113_v43 = vpop.xlane.xlu1 %2112 }
 0x8b2   : > { %4496 = vrcp.f32 %v2113_v43 }
 0x8b3   : > { %4498 = vrcp.f32 %v2107_v41 }
 0x8b4   : > { %v2122_v17 = vpop.xlane.xlu0 %2121  ;;  %4500 = vrcp.f32 %v2110_v40 }
 0x8b5   : > { %v4364_v20 = vpop.permute.xlu1 %4363  ;;  %4502 = vrcp.f32 %v2116_v14 }
 0x8b6   : > { %v4366_v44 = vunpack.i.h.bf16 %v4364_v20  ;;  %v4365_v23 = vunpack.i.l.bf16 %v4364_v20 }
 0x8b8   : > { %v4088_v45 = vpack.c.bf16 %v4366_v44, %v4365_v23  ;;  %v4359_v4 = vpop.permute.xlu0 %4358 }
 0x8b9   : > { %v4361_v52 = vunpack.i.h.bf16 %v4359_v4  ;;  %v4360_v58 = vunpack.i.l.bf16 %v4359_v4  ;;  %v4540_v4 = vld [vmem:[#allocation8 + $0x8] sm:$0xff] }
 0x8ba   : > { %4089 = vmatprep.subr.bf16.mxu0 %v4088_v45 }
 0x8bb   : > { %v4084_v5 = vpack.c.bf16 %v4361_v52, %v4360_v58  ;;  %4091 = vmatpush3.bf16.msra.mxu0 %v4088_v45  ;;  %v4541_v58 = vld [vmem:[#allocation8] sm:$0xff] }
 0x8bc   : > { %v4497_v33 = vpop.eup %4496  ;;  %v4374_v34 = vpop.permute.xlu0 %4373 }
 0x8bd   : > { %v4499_v32 = vpop.eup %4498  ;;  %4085 = vmatprep.subr.bf16.mxu1 %v4084_v5  ;;  %v2135_v27 = vmul.f32 %v4497_v33, %v5418_v36  ;;  %v4376_v1 = vunpack.i.h.bf16 %v4374_v34  ;;  %v4375_v3 = vunpack.i.l.bf16 %v4374_v34 }
 0x8be   : > { %4087 = vmatpush3.bf16.msra.mxu1 %v4084_v5  ;;  %v4501_v54 = vpop.eup %4500  ;;  %v2133_v11 = vmul.f32 %v4499_v32, %v5410_v59 }
 0x8bf   : > { %3878 = vmatprep.mubr.msk.f32.mxu0 %vm302_vm0, %v2135_v27  ;;  %3884 = vmatprep.subr.mxu1 %v2357_v62  ;;  %v2134_v49 = vmul.f32 %v4501_v54, %v5408_v35  ;;  %v4503_v55 = vpop.eup %4502  ;;  %v4096_v36 = vpack.c.bf16 %v4376_v1, %v4375_v3 }
 0x8c0   : > { %v4384_v61 = vpop.permute.xlu0 %4383  ;;  %v2136_v2 = vmul.f32 %v4503_v55, %v5416_v57 }
 0x8c1   : > { %v4386_v46 = vunpack.i.h.bf16 %v4384_v61  ;;  %v4385_v30 = vunpack.i.l.bf16 %v4384_v61  ;;  %3865 = vmatmul.mubr.msk.f32.vlgmr.msra.gmra.mrb[20].mxu1 %vm302_vm0, %v2132_v53  ;;  %v4542_v53 = vld [vmem:[#allocation8 + $0x10] sm:$0xff]  ;;  %v4543_v61 = vld [vmem:[#allocation8 + $0x18] sm:$0xff] }
 0x8c2   : > { %3867 = vmatprep.mubr.msk.f32.mxu1 %vm302_vm0, %v2133_v11  ;;  %3885 = vmatpush3.msra.mxu1 %v2357_v62 }
 0x8c3   : > { %v4108_v37 = vpack.c.bf16 %v4386_v46, %v4385_v30 }
 0x8c4   : > { %v2496_v12 = vpop.permute.xlu0 %2495 }
 0x8c5   : > { %3868 = vmatmul.mubr.msk.f32.gmra.mrb[22].mxu1 %vm302_vm0, %v2134_v49  ;;  %4110 = vmatprep.subr.msk.bf16.mxu1 %vm5069_vm2, %v4108_v37 }
 0x8c8   : > { %v2500_v10 = vpop.permute.xlu0 %2499 }
 0x8cc   : > { %v2613_v42 = vpop.permute.xlu0 %2612 }
 0x8e6   : > { %v2119_v0 = vpop.xlane.xlu1 %2118 }
 0x8e7   : > { %4504 = vrcp.f32 %v2119_v0 }
 0x8e8   : > { %4506 = vrcp.f32 %v2122_v17  ;;  %v2617_v17 = vpop.permute.xlu0 %2616 }
 0x8ea   : > { %v4369_v59 = vpop.permute.xlu1 %4368 }
 0x8eb   : > { %v4371_v8 = vunpack.i.h.bf16 %v4369_v59  ;;  %v4370_v47 = vunpack.i.l.bf16 %v4369_v59 }
 0x8ed   : > { %v4092_v6 = vpack.c.bf16 %v4371_v8, %v4370_v47 }
 0x8ee   : > { %v4379_v9 = vpop.permute.xlu1 %4378 }
 0x8ef   : > { %4093 = vmatprep.subr.bf16.mxu0 %v4092_v6  ;;  %v4381_v51 = vunpack.i.h.bf16 %v4379_v9  ;;  %v4380_v56 = vunpack.i.l.bf16 %v4379_v9 }
 0x8f0   : > { %4095 = vmatpush3.bf16.msra.mxu0 %v4092_v6 }
 0x8f1   : > { %v4505_v35 = vpop.eup %4504  ;;  %4098 = vmatprep.subr.msk.bf16.mxu0 %vm5069_vm2, %v4096_v36  ;;  %v4102_v28 = vpack.c.bf16 %v4381_v51, %v4380_v56 }
 0x8f2   : > { %v4507_v13 = vpop.eup %4506  ;;  %v2137_v48 = vmul.f32 %v4505_v35, %v5446_v31  ;;  %v4389_v57 = vpop.permute.xlu1 %4388 }
 0x8f3   : > { %3879 = vmatmul.mubr.msk.f32.vlgmr.msra.gmra.mrb[36].mxu0 %vm302_vm0, %v2136_v2  ;;  %v2138_v63 = vmul.f32 %v4507_v13, %v5424_v50  ;;  %v4391_v26 = vunpack.i.h.bf16 %v4389_v57  ;;  %v4390_v15 = vunpack.i.l.bf16 %v4389_v57 }
 0x8f4   : > { %3881 = vmatprep.mubr.msk.f32.mxu0 %vm302_vm0, %v2137_v48 }
 0x8f5   : > { %v4114_v21 = vpack.c.bf16 %v4391_v26, %v4390_v15 }
 0x8f6   : > { %v2498_v7 = vpop.permute.xlu1 %2497 }
 0x8f7   : > { %3882 = vmatmul.mubr.msk.f32.gmra.mrb[38].mxu0 %vm302_vm0, %v2138_v63 }
 0x8f8   : > { %3906 = vmatprep.mubr.msk.f32.mxu0 %vm448_vm1, %v2496_v12 }
 0x8f9   : > { %4101 = vmatpush3.bf16.xpose.msk.msra.mxu0 %vm5069_vm2, %v4096_v36 }
 0x8fa   : > { %4104 = vmatprep.subr.msk.bf16.mxu0 %vm5069_vm2, %v4102_v28  ;;  %v2502_v50 = vpop.permute.xlu1 %2501 }
 0x8fe   : > { %v2615_v43 = vpop.permute.xlu1 %2614 }
 0x901   : > { %4107 = vmatpush3.bf16.xpose.msk.msra.mxu0 %vm5069_vm2, %v4102_v28 }
 0x902   : > { %v2619_v29 = vpop.permute.xlu1 %2618 }
 0x908   : > { %3907 = vmatmul.mubr.msk.f32.vlgmr.msra.gmra.mrb[40].mxu0 %vm448_vm1, %v2498_v7 }
 0x909   : > { %3909 = vmatprep.mubr.msk.f32.mxu0 %vm448_vm1, %v2500_v10 }
 0x90c   : > { %3910 = vmatmul.mubr.msk.f32.gmra.mrb[42].mxu0 %vm448_vm1, %v2502_v50 }
 0x994   : > { %v3866_v31 = vpop.f32.mrb[20].mxu1 }
 0x995   : > { %v2229_v18 = vpop.f32.mrb[21].mxu1 }
 0x996   : > { %3886 = vmatprep.mubr.msk.f32.mxu1 %vm448_vm1, %v2229_v18 }
 0x997   : > { %3887 = vmatmul.mubr.msk.f32.vlgmr.msra.gmra.mrb[12].mxu1 %vm448_vm1, %v3866_v31 }
 0x998   : > { %4113 = vmatpush3.bf16.xpose.msk.msra.mxu1 %vm5069_vm2, %v4108_v37  ;;  %v3869_v24 = vpop.f32.mrb[22].mxu1 }
 0x999   : > { %4116 = vmatprep.subr.msk.bf16.mxu1 %vm5069_vm2, %v4114_v21  ;;  %v2239_v38 = vpop.f32.mrb[23].mxu1 }
 0x99a   : > { %3889 = vmatprep.mubr.msk.f32.mxu1 %vm448_vm1, %v2239_v38 }
 0x99b   : > { %3890 = vmatmul.mubr.msk.f32.gmra.mrb[14].mxu1 %vm448_vm1, %v3869_v24 }
 0x9a0   : > { %4119 = vmatpush3.bf16.xpose.msk.msra.mxu1 %vm5069_vm2, %v4114_v21 }
 0x9c6   : > { %v3880_v39 = vpop.f32.mrb[36].mxu0 }
 0x9c7   : > { %v2338_v40 = vpop.f32.mrb[37].mxu0 }
 0x9c8   : > { %3892 = vmatprep.mubr.msk.f32.mxu1 %vm448_vm1, %v2338_v40 }
 0x9c9   : > { %3893 = vmatmul.mubr.msk.f32.gmra.mrb[16].mxu1 %vm448_vm1, %v3880_v39 }
 0x9ca   : > { %v3883_v41 = vpop.f32.mrb[38].mxu0 }
 0x9cb   : > { %v2348_v14 = vpop.f32.mrb[39].mxu0 }
 0x9cc   : > { %3895 = vmatprep.mubr.msk.f32.mxu1 %vm448_vm1, %v2348_v14 }
 0x9cd   : > { %3896 = vmatmul.mubr.msk.f32.gmra.mrb[18].mxu1 %vm448_vm1, %v3883_v41 }
 0x9ce   : > { %3920 = vmatprep.mubr.msk.f32.mxu1 %vm448_vm1, %v2613_v42 }
 0x9d1   : > { %3921 = vmatmul.mubr.msk.f32.vlgmr.msra.gmra.mrb[24].mxu1 %vm448_vm1, %v2615_v43 }
 0x9d2   : > { %3923 = vmatprep.mubr.msk.f32.mxu1 %vm448_vm1, %v2617_v17 }
 0x9d5   : > { %3924 = vmatmul.mubr.msk.f32.gmra.mrb[26].mxu1 %vm448_vm1, %v2619_v29 }
 0x9db   : > { %v3908_v20 = vpop.f32.mrb[40].mxu0 }
 0x9dc   : > { %v2730_v44 = vmul.f32 0.35355338, %v3908_v20  ;;  %v2593_v23 = vpop.f32.mrb[41].mxu0 }
 0x9dd   : > { %v2729_v45 = vmul.f32 0.35355338, %v2593_v23 }
 0x9de   : > { %v2738_v52 = vadd.f32 %v4540_v4, %v2730_v44 }
 0x9df   : > { %v2737_v60 = vadd.f32 %v4541_v58, %v2729_v45  ;;  %v3911_v5 = vpop.f32.mrb[42].mxu0 }
 0x9e0   : > { %v2603_v33 = vpop.f32.mrb[43].mxu0  ;;  %v2748_v34 = vsel %vm302_vm0, %v2738_v52, -inf  ;;  %v2732_v62 = vmul.f32 0.35355338, %v3911_v5 }
 0x9e1   : > { %v2731_v32 = vmul.f32 0.35355338, %v2603_v33  ;;  %2749 = vmax.xlane.f32.xlu1 %v2748_v34  ;;  %v2745_v27 = vsel %vm302_vm0, %v2737_v60, -inf }
 0x9e2   : > { %2746 = vmax.xlane.f32.xlu0 %v2745_v27  ;;  %v2740_v11 = vadd.f32 %v4543_v61, %v2732_v62 }
 0x9e3   : > { %v2739_v54 = vadd.f32 %v4542_v53, %v2731_v32 }
 0x9e4   : > { %v2754_v30 = vsel %vm302_vm0, %v2740_v11, -inf }
 0x9e5   : > { %v2751_v46 = vsel %vm302_vm0, %v2739_v54, -inf }
 0x9e6   : > { %2752 = vmax.xlane.f32.xlu0 %v2751_v46 }
 0x9ea   : > { %2755 = vmax.xlane.f32.xlu0 %v2754_v30 }
 0xa6e   : > { %v2750_v0 = vpop.xlane.xlu1 %2749 }
 0xa6f   : > { %v2747_v37 = vpop.xlane.xlu0 %2746  ;;  %v2770_v1 = vsub.f32 %v2738_v52, %v2750_v0 }
 0xa70   : > { %v2769_v59 = vsub.f32 %v2737_v60, %v2747_v37 }
 0xa71   : > { %v2779_v6 = vmul.f32 1.442695, %v2770_v1 }
 0xa72   : > { %v2777_v3 = vmul.f32 1.442695, %v2769_v59 }
 0xa73   : > { %v2753_v49 = vpop.xlane.xlu0 %2752 }
 0xa74   : > { %v2771_v8 = vsub.f32 %v2739_v54, %v2753_v49  ;;  %4508 = vpow2.f32 %v2777_v3 }
 0xa75   : > { %4510 = vpow2.f32 %v2779_v6 }
 0xa76   : > { %v2781_v36 = vmul.f32 1.442695, %v2771_v8 }
 0xa77   : > { %v2756_v47 = vpop.xlane.xlu0 %2755 }
 0xa78   : > { %v2772_v55 = vsub.f32 %v2740_v11, %v2756_v47  ;;  %4512 = vpow2.f32 %v2781_v36 }
 0xa7a   : > { %v2783_v35 = vmul.f32 1.442695, %v2772_v55 }
 0xa7c   : > { %4514 = vpow2.f32 %v2783_v35 }
 0xa7e   : > { %v4509_v10 = vpop.eup %4508 }
 0xa7f   : > { %v5547_v15 = vpop.eup %4510  ;;  %v2793_v18 = vsel %vm302_vm0, %v4509_v10, 0.0 }
 0xa80   : > { %v2796_v24 = vsel %vm302_vm0, %v5547_v15, 0.0 }
 0xa82   : > { %v5550_v21 = vpop.eup %4512 }
 0xa83   : > { %v2799_v40 = vsel %vm302_vm0, %v5550_v21, 0.0 }
 0xa86   : > { %v5554_v38 = vpop.eup %4514 }
 0xa87   : > { %v2802_v41 = vsel %vm302_vm0, %v5554_v38, 0.0 }
 0xaa4   : > { %v3922_v2 = vpop.f32.mrb[24].mxu1 }
 0xaa5   : > { %v2734_v9 = vmul.f32 0.35355338, %v3922_v2  ;;  %v2710_v13 = vpop.f32.mrb[25].mxu1 }
 0xaa6   : > { %v2733_v48 = vmul.f32 0.35355338, %v2710_v13 }
 0xaa7   : > { %v2742_v51 = vadd.f32 %v4540_v4, %v2734_v9 }
 0xaa8   : > { %v2741_v56 = vadd.f32 %v4541_v58, %v2733_v48  ;;  %v3925_v63 = vpop.f32.mrb[26].mxu1 }
 0xaa9   : > { %v2736_v12 = vmul.f32 0.35355338, %v3925_v63  ;;  %v2720_v28 = vpop.f32.mrb[27].mxu1  ;;  %v2760_v57 = vsel %vm302_vm0, %v2742_v51, -inf }
 0xaaa   : > { %2761 = vmax.xlane.f32.xlu0 %v2760_v57  ;;  %v2757_v7 = vsel %vm302_vm0, %v2741_v56, -inf  ;;  %v2735_v31 = vmul.f32 0.35355338, %v2720_v28 }
 0xaab   : > { %v2744_v50 = vadd.f32 %v4543_v61, %v2736_v12  ;;  %2758 = vmax.xlane.f32.xlu1 %v2757_v7 }
 0xaac   : > { %v2743_v39 = vadd.f32 %v4542_v53, %v2735_v31 }
 0xaad   : > { %v2766_v26 = vsel %vm302_vm0, %v2744_v50, -inf }
 0xaae   : > { %2767 = vmax.xlane.f32.xlu0 %v2766_v26  ;;  %v2763_v42 = vsel %vm302_vm0, %v2743_v39, -inf }
 0xaaf   : > { %2794 = vadd.xlane.f32.xlu1 %v2793_v18 }
 0xab2   : > { %2797 = vadd.xlane.f32.xlu0 %v2796_v24 }
 0xab3   : > { %2800 = vadd.xlane.f32.xlu1 %v2799_v40 }
 0xab6   : > { %2803 = vadd.xlane.f32.xlu0 %v2802_v41 }
 0xab7   : > { %2764 = vmax.xlane.f32.xlu1 %v2763_v42 }
 0xac8   : > { %4393 = vrot.lane.b32.xlu1 %v5033_v16, %s4750_s17 }
 0xb37   : > { %v2762_v14 = vpop.xlane.xlu0 %2761 }
 0xb38   : > { %v2774_v43 = vsub.f32 %v2742_v51, %v2762_v14  ;;  %v2759_v17 = vpop.xlane.xlu1 %2758 }
 0xb39   : > { %v2773_v29 = vsub.f32 %v2741_v56, %v2759_v17 }
 0xb3a   : > { %v2787_v20 = vmul.f32 1.442695, %v2774_v43 }
 0xb3b   : > { %v2785_v44 = vmul.f32 1.442695, %v2773_v29  ;;  %v2768_v23 = vpop.xlane.xlu0 %2767 }
 0xb3c   : > { %4516 = vpow2.f32 %v2787_v20  ;;  %v2776_v45 = vsub.f32 %v2744_v50, %v2768_v23  ;;  %v2795_v4 = vpop.xlane.xlu1 %2794 }
 0xb3d   : > { %4518 = vpow2.f32 %v2785_v44  ;;  %v3481_v44 = vld [vmem:[%s5666_s3] ss:$0 sm:$0xff] }
 0xb3e   : > { %v2791_v52 = vmul.f32 1.442695, %v2776_v45  ;;  %4520 = vrcp.f32 %v2795_v4 }
 0xb3f   : > { %v2798_v59 = vpop.xlane.xlu0 %2797 }
 0xb40   : > { %4522 = vpow2.f32 %v2791_v52  ;;  %v2801_v58 = vpop.xlane.xlu1 %2800 }
 0xb43   : > { %v2804_v1 = vpop.xlane.xlu0 %2803 }
 0xb44   : > { %v2765_v60 = vpop.xlane.xlu1 %2764 }
 0xb45   : > { %v2775_v30 = vsub.f32 %v2743_v39, %v2765_v60  ;;  %v3051_v39 = vld [vmem:[#allocation7 + $0x18] sm:$0xff] }
 0xb46   : > { %v5563_v5 = vpop.eup %4516 }
 0xb47   : > { %v4519_v33 = vpop.eup %4518  ;;  %v2808_v16 = vsel %vm302_vm0, %v5563_v5, 0.0  ;;  %v2789_v37 = vmul.f32 1.442695, %v2775_v30 }
 0xb48   : > { %v4521_v34 = vpop.eup %4520  ;;  %2809 = vadd.xlane.f32.xlu0 %v2808_v16  ;;  %v4394_v62 = vpop.permute.xlu1 %4393  ;;  %v2805_v32 = vsel %vm302_vm0, %v4519_v33, 0.0 }
 0xb49   : > { %v4396_v27 = vunpack.i.h.bf16 %v4394_v62  ;;  %v4395_v53 = vunpack.i.l.bf16 %v4394_v62  ;;  %2806 = vadd.xlane.f32.xlu1 %v2805_v32  ;;  %v2825_v54 = vmul.f32 %v4521_v34, %v4509_v10  ;;  %4524 = vpow2.f32 %v2789_v37 }
 0xb4a   : > { %v5568_v61 = vpop.eup %4522  ;;  %4526 = vrcp.f32 %v2798_v59 }
 0xb4b   : > { %v4120_v11 = vpack.c.bf16 %v4396_v27, %v4395_v53  ;;  %3934 = vmatprep.mubr.msk.f32.mxu0 %vm302_vm0, %v2825_v54  ;;  %v2814_v46 = vsel %vm302_vm0, %v5568_v61, 0.0 }
 0xb4c   : > { %2815 = vadd.xlane.f32.xlu0 %v2814_v46 }
 0xb4d   : > { %4121 = vmatprep.subr.bf16.mxu0 %v4120_v11 }
 0xb4e   : > { %4123 = vmatpush3.bf16.msra.mxu0 %v4120_v11 }
 0xb53   : > { %v4525_v49 = vpop.eup %4524 }
 0xb54   : > { %v2811_v0 = vsel %vm302_vm0, %v4525_v49, 0.0  ;;  %v4527_v9 = vpop.eup %4526 }
 0xb55   : > { %v2826_v56 = vmul.f32 %v4527_v9, %v5547_v15 }
 0xb5a   : > { %4403 = vrot.lane.b32.xlu1 %v5051_v22, %s4750_s17 }
 0xb62   : > { %4398 = vrot.lane.b32.xlu0 %v5042_v19, %s4750_s17 }
 0xb7e   : > { %2812 = vadd.xlane.f32.xlu1 %v2811_v0 }
 0xb8f   : > { %4408 = vrot.lane.b32.xlu1 %v5062_v25, %s4750_s17 }
 0xbd5   : > { %v2810_v3 = vpop.xlane.xlu0 %2809 }
 0xbd6   : > { %v2807_v8 = vpop.xlane.xlu1 %2806 }
 0xbd7   : > { %4528 = vrcp.f32 %v2807_v8 }
 0xbd8   : > { %4530 = vrcp.f32 %v2801_v58 }
 0xbd9   : > { %v2816_v22 = vpop.xlane.xlu0 %2815  ;;  %4532 = vrcp.f32 %v2804_v1 }
 0xbda   : > { %v4404_v47 = vpop.permute.xlu1 %4403  ;;  %4534 = vrcp.f32 %v2810_v3 }
 0xbdb   : > { %v4406_v19 = vunpack.i.h.bf16 %v4404_v47  ;;  %v4405_v6 = vunpack.i.l.bf16 %v4404_v47 }
 0xbdd   : > { %v4128_v55 = vpack.c.bf16 %v4406_v19, %v4405_v6  ;;  %v4399_v36 = vpop.permute.xlu0 %4398 }
 0xbde   : > { %v4401_v35 = vunpack.i.h.bf16 %v4399_v36  ;;  %v4400_v2 = vunpack.i.l.bf16 %v4399_v36 }
 0xbdf   : > { %4129 = vmatprep.subr.bf16.mxu1 %v4128_v55 }
 0xbe0   : > { %v4124_v13 = vpack.c.bf16 %v4401_v35, %v4400_v2  ;;  %4131 = vmatpush3.bf16.msra.mxu1 %v4128_v55 }
 0xbe1   : > { %v4529_v25 = vpop.eup %4528 }
 0xbe2   : > { %v4531_v48 = vpop.eup %4530  ;;  %4125 = vmatprep.subr.bf16.mxu0 %v4124_v13  ;;  %v2829_v51 = vmul.f32 %v4529_v25, %v4519_v33 }
 0xbe3   : > { %4127 = vmatpush3.bf16.msra.mxu0 %v4124_v13  ;;  %v4533_v63 = vpop.eup %4532  ;;  %v2827_v12 = vmul.f32 %v4531_v48, %v5550_v21 }
 0xbe4   : > { %3948 = vmatprep.mubr.msk.f32.mxu1 %vm302_vm0, %v2829_v51  ;;  %v2828_v28 = vmul.f32 %v4533_v63, %v5554_v38  ;;  %v4535_v15 = vpop.eup %4534 }
 0xbe5   : > { %v2830_v18 = vmul.f32 %v4535_v15, %v5563_v5 }
 0xbe6   : > { %3935 = vmatmul.mubr.msk.f32.vlgmr.msra.gmra.mrb[44].mxu0 %vm302_vm0, %v2826_v56 }
 0xbe7   : > { %3937 = vmatprep.mubr.msk.f32.mxu0 %vm302_vm0, %v2827_v12 }
 0xbea   : > { %3938 = vmatmul.mubr.msk.f32.gmra.mrb[46].mxu0 %vm302_vm0, %v2828_v28 }
 0xc0b   : > { %v2813_v57 = vpop.xlane.xlu1 %2812 }
 0xc0c   : > { %4536 = vrcp.f32 %v2813_v57 }
 0xc0d   : > { %4538 = vrcp.f32 %v2816_v22 }
 0xc0f   : > { %v4409_v7 = vpop.permute.xlu1 %4408 }
 0xc10   : > { %v4411_v10 = vunpack.i.h.bf16 %v4409_v7  ;;  %v4410_v50 = vunpack.i.l.bf16 %v4409_v7 }
 0xc12   : > { %v4132_v26 = vpack.c.bf16 %v4411_v10, %v4410_v50 }
 0xc14   : > { %4133 = vmatprep.subr.bf16.mxu1 %v4132_v26 }
 0xc15   : > { %4135 = vmatpush3.bf16.msra.mxu1 %v4132_v26 }
 0xc16   : > { %v4537_v31 = vpop.eup %4536  ;;  %3954 = vmatprep.subr.mxu1 %v3051_v39 }
 0xc17   : > { %v4539_v21 = vpop.eup %4538  ;;  %v2831_v24 = vmul.f32 %v4537_v31, %v4525_v49 }
 0xc18   : > { %3949 = vmatmul.mubr.msk.f32.vlgmr.msra.gmra.mrb[28].mxu1 %vm302_vm0, %v2830_v18  ;;  %v2832_v38 = vmul.f32 %v4539_v21, %v5568_v61 }
 0xc19   : > { %3951 = vmatprep.mubr.msk.f32.mxu1 %vm302_vm0, %v2831_v24  ;;  %3955 = vmatpush3.msra.mxu1 %v3051_v39 }
 0xc1c   : > { %3952 = vmatmul.mubr.msk.f32.gmra.mrb[30].mxu1 %vm302_vm0, %v2832_v38 }
 0xcb9   : > { %v3936_v40 = vpop.f32.mrb[44].mxu0 }
 0xcba   : > { %v2923_v41 = vpop.f32.mrb[45].mxu0 }
 0xcbb   : > { %3956 = vmatprep.mubr.msk.f32.mxu1 %vm448_vm1, %v2923_v41 }
 0xcbc   : > { %3957 = vmatmul.mubr.msk.f32.vlgmr.msra.gmra.mrb[12].mxu1 %vm448_vm1, %v3936_v40 }
 0xcbd   : > { %v3939_v42 = vpop.f32.mrb[46].mxu0 }
 0xcbe   : > { %v2933_v14 = vpop.f32.mrb[47].mxu0 }
 0xcbf   : > { %3959 = vmatprep.mubr.msk.f32.mxu1 %vm448_vm1, %v2933_v14 }
 0xcc0   : > { %3960 = vmatmul.mubr.msk.f32.gmra.mrb[14].mxu1 %vm448_vm1, %v3939_v42 }
 0xceb   : > { %v3950_v43 = vpop.f32.mrb[28].mxu1 }
 0xcec   : > { %v3032_v17 = vpop.f32.mrb[29].mxu1 }
 0xced   : > { %3962 = vmatprep.mubr.msk.f32.mxu1 %vm448_vm1, %v3032_v17 }
 0xcee   : > { %3963 = vmatmul.mubr.msk.f32.gmra.mrb[16].mxu1 %vm448_vm1, %v3950_v43 }
 0xcef   : > { %v3953_v29 = vpop.f32.mrb[30].mxu1 }
 0xcf0   : > { %v3042_v20 = vpop.f32.mrb[31].mxu1 }
 0xcf1   : > { %3965 = vmatprep.mubr.msk.f32.mxu1 %vm448_vm1, %v3042_v20 }
 0xcf2   : > { %3966 = vmatmul.mubr.msk.f32.gmra.mrb[18].mxu1 %vm448_vm1, %v3953_v29 }
 0xd8f   : > { %v3958_v23 = vpop.f32.mrb[12].mxu1 }
 0xd90   : > { %v3197_v45 = vadd.f32 %v3958_v23, %v3481_v44  ;;  %v3142_v4 = vpop.f32.mrb[13].mxu1 }
 0xd91   : > { %v3196_v52 = vadd.f32 %v3481_v44, %v3142_v4 }
 0xd92   : > { %3205 = vst.msk [vmem:[%s287_s6 + $0x8] sm:$0xff] %vm302_vm0, %v3197_v45 }
 0xd93   : > { %3204 = vst.msk [vmem:[%s287_s6] sm:$0xff] %vm302_vm0, %v3196_v52  ;;  %v3961_v58 = vpop.f32.mrb[14].mxu1 }
 0xd94   : > { %v3199_v60 = vadd.f32 %v3961_v58, %v3481_v44  ;;  %v3152_v5 = vpop.f32.mrb[15].mxu1 }
 0xd95   : > { %v3198_v33 = vadd.f32 %v3481_v44, %v3152_v5 }
 0xd96   : > { %3207 = vst.msk [vmem:[%s287_s6 + $0x18] sm:$0xff] %vm302_vm0, %v3199_v60 }
 0xd97   : > { %3206 = vst.msk [vmem:[%s287_s6 + $0x10] sm:$0xff] %vm302_vm0, %v3198_v33 }
 0xdc1   : > { %v3964_v16 = vpop.f32.mrb[16].mxu1 }
 0xdc2   : > { %v3201_v34 = vadd.f32 %v3964_v16, %v3481_v44  ;;  %v3162_v62 = vpop.f32.mrb[17].mxu1 }
 0xdc3   : > { %v3200_v32 = vadd.f32 %v3481_v44, %v3162_v62 }
 0xdc4   : > { %3209 = vst.msk [vmem:[%s287_s6 + $0x28] sm:$0xff] %vm302_vm0, %v3201_v34 }
 0xdc5   : > { %3208 = vst.msk [vmem:[%s287_s6 + $0x20] sm:$0xff] %vm302_vm0, %v3200_v32  ;;  %v3967_v27 = vpop.f32.mrb[18].mxu1 }
 0xdc6   : > { %v3203_v53 = vadd.f32 %v3967_v27, %v3481_v44  ;;  %v3172_v54 = vpop.f32.mrb[19].mxu1 }
 0xdc7   : > { %v3202_v61 = vadd.f32 %v3481_v44, %v3172_v54 }
 0xdc8   : > { %3211 = vst.msk [vmem:[%s287_s6 + $0x38] sm:$0xff] %vm302_vm0, %v3203_v53 }
 0xdc9   : > { %3210 = vst.msk [vmem:[%s287_s6 + $0x30] sm:$0xff] %vm302_vm0, %v3202_v61 }
 0xdca   : > { %4671 = shalt.err (!%p4668_p4)
}
 0xdcb   : > { %s4672_s9 = scalar_lea.hbm %s5615_s27, 1024  ;;  %s4676_s10 = scalar_lea.hbm %s5668_s5, 2048 }
 0xdcc   : > { %p4673_p9 = scmp.ne.s32.totalorder %s5615_s27, %s4672_s9  ;;  %p4677_p8 = scmp.lt.u32.totalorder %s5615_s27, %s5668_s5 }
 0xdcd   : > { %p4678_p13 = scmp.lt.u32.totalorder %s4676_s10, %s4672_s9  ;;  %p4680_p10 = scmp.lt.u32.totalorder %s4672_s9, %s5615_s27 }
 0xdce   : > { %p4674_p0 = pnand %p4673_p9, %p4938_p5 }
 0xdcf   : > { %p4679_p6 = por %p4678_p13, %p4677_p8 }
 0xdd0   : > { %p4675_p11 = pneg %p4674_p0 }
 0xdd1   : > { %p4681_p3 = por %p4680_p10, %p4679_p6 }
 0xdd3   : > { %p4682_p7 = pnand %p4681_p3, %p4675_p11 }
 0xdd5   : > { %4685 = shalt.err (!%p4682_p7)
}
 0xdd6   : > { %s4752_s24 = smov 128   ;;  %s4753_s26 = smov 8  }
 0xdd7   : > { %4174 = dma.vmem_to_hbm [thread:$0]  (%p4938_p5), %s5617_s8, 1024, %s5615_s27, %s3213_s22, %s4752_s24, %s4752_s24, %s4753_s26  }
 0xdd8 PF: > { %s3242_s23 = sand.u32 1, %s4720_s18   ;;  %p5688_p12 = scmp.ne.s32.totalorder %s5673_s25, 0 }
 0xdd9   : > { %p5689_p1 = scmp.ge.s32.totalorder %s4732_s21, 2  ;;  %s3243_s13 = scalar_lea.sflag [#allocation4], %s3242_s23 }
 0xddb   : > { %p4191_p2 = pnand %p5689_p1, %p5688_p12 }
 0xddd   : > { %4715 = dma.done.wait (!%p4191_p2), %s3243_s13, 1024  }
 0xdde   : > { %4717 = vsyncadd (!%p4191_p2), %s3243_s13, 4294966272  ;;  %p20_p4 = scmp.ge.s32.totalorder %s4924_s14, 4   ;;  %s5690_s18 = smov %s4724_s19 }
 0xddf   : > { %s5691_s19 = smov %s4728_s20  ;;  %s5692_s20 = smov %s4934_s30 }
 0xde0   : > { %s5693_s21 = smov %s4924_s14  ;;  %22 = sbr.rel (!%p20_p4) target bundleno = 7 (0x7), region = 97 }
 0xde7   :  { %3248 = vsyncpa [#allocation3], 1 }
 0xde8   :  { %3250 = vsyncpa [#allocation3 + $0x1], 1 }
 0xde9   :  { %3251 = vsyncpa [#allocation6], 1 }
 0xdea   :  { %3252 = vsyncpa [#allocation9], 1 }
 0xdeb   :  { %3253 = vsyncpa [#allocation4], 1 }
 0xdec   :  { %3255 = vsyncpa [#allocation4 + $0x1], 1 }

</bundles_post_ra>
